<compile_context>
chip_gen: v7x
topology: tpu7x:2x2x1
jax: 0.10.0
libtpu: 0.0.40
codegen_flags: <defaults>
</compile_context>

<pallas_src>
import functools

import jax
import jax.numpy as jnp
from jax import lax
from jax.experimental import pallas as pl
from jax.experimental.pallas import tpu as pltpu

VMEM = pl.BlockSpec(memory_space=pltpu.MemorySpace.VMEM)
BN_EPS = 1e-5
LANE = 128
_BIG = 1e30  # finite "infinity" for self-loop / already-selected masking


def _round_up(n, m):
    return (n + m - 1) // m * m


# ----------------------------------------------------------------------------
# Kernel 1: backbone conv (im2col matmul) + bias + ReLU + global average pool
# TODO(synk): the real `model_b.base` is a full CNN backbone (e.g. ResNet);
#             a single deterministic 3x3 conv stage stands in for it here.
# ----------------------------------------------------------------------------
def _conv_gap_kernel(p_ref, w_ref, b_ref, o_ref, *, inv_hw, chunk):
    s = pl.program_id(1)

    @pl.when(s == 0)
    def _():
        o_ref[...] = jnp.zeros_like(o_ref)

    tb, ts, kp = p_ref.shape
    f = w_ref.shape[1]
    n_chunks = ts // chunk

    # Spatial sub-chunks keep the live f32 activation at (tb*chunk, f) ~16
    # vregs (no spills), while the flattened 2D lhs gives M = tb*chunk rows per
    # MXU weight load.  Static python loop -> static (tile-aligned) slices.
    acc = jnp.zeros((tb, f), jnp.float32)
    for c in range(n_chunks):
        pc = p_ref[:, c * chunk:(c + 1) * chunk, :]          # (tb, chunk, kp) bf16
        y = lax.dot_general(pc.reshape(tb * chunk, kp), w_ref[...],
                            (((1,), (0,)), ((), ())),
                            preferred_element_type=jnp.float32)  # (tb*chunk, f)
        y = jnp.maximum(y + b_ref[...], 0.0)                 # bias + ReLU
        acc = acc + jnp.sum(y.reshape(tb, chunk, f), axis=1)  # partial GAP
    o_ref[...] += acc                                        # resident accumulator

    @pl.when(s == pl.num_programs(1) - 1)
    def _():
        o_ref[...] *= inv_hw                                 # finalize mean


def conv_relu_gap(patches, w_flat, bias, *, hw):
    B, S, KP = patches.shape
    F = w_flat.shape[1]
    TB = 4 if B % 4 == 0 else B        # >=2 batch blocks -> both v7x TCs busy
    TS = 64 if S % 64 == 0 else S
    CH = 32 if TS % 32 == 0 else TS
    grid = (B // TB, S // TS)
    out = pl.pallas_call(
        functools.partial(_conv_gap_kernel, inv_hw=1.0 / hw, chunk=CH),
        out_shape=jax.ShapeDtypeStruct((B // TB, TB, F), jnp.float32),
        grid=grid,
        in_specs=[
            pl.BlockSpec((TB, TS, KP), lambda b, s: (b, s, 0)),
            pl.BlockSpec((KP, F), lambda b, s: (0, 0)),
            pl.BlockSpec((1, F), lambda b, s: (0, 0)),
        ],
        # leading dim squeezed so the kernel sees a (TB, F) GAP accumulator
        out_specs=pl.BlockSpec((None, TB, F), lambda b, s: (b, 0, 0)),
        compiler_params=pltpu.CompilerParams(
            dimension_semantics=("parallel", "arbitrary")),
    )(patches, w_flat, bias)
    return out.reshape(B, F)


# ----------------------------------------------------------------------------
# Fused graph stage: kNN edges + GraphConv (+ BN / classifier epilogues)
# ----------------------------------------------------------------------------
def _knn_adjacency(feat, k):
    """Dense kNN adjacency (self excluded), computed fully in-register.

    Ranking uses r_ij = ||x_j||^2 - 2 x_i.x_j; the per-row constant ||x_i||^2
    cannot change the per-row ordering, so only the Gram diagonal is needed
    (one where + one axis-0 reduce, reusing the diag mask already required for
    the self-loop exclusion).  Ties resolve to the lowest index, matching
    lax.top_k / torch.topk.
    """
    B = feat.shape[0]
    xb = feat.astype(jnp.bfloat16)
    gram = lax.dot_general(xb, xb, (((1,), (1,)), ((), ())),
                           preferred_element_type=jnp.float32)         # (B, B)
    row = lax.broadcasted_iota(jnp.int32, (B, B), 0)
    col = lax.broadcasted_iota(jnp.int32, (B, B), 1)
    diag = row == col
    sq_j = jnp.sum(jnp.where(diag, gram, 0.0), axis=0, keepdims=True)  # (1, B)
    r = jnp.where(diag, _BIG, sq_j - 2.0 * gram)

    adj = jnp.zeros((B, B), jnp.float32)
    for _ in range(k):                       # k is tiny & static -> unrolled
        m = jnp.min(r, axis=1, keepdims=True)
        first = jnp.where(r == m, col, B)                      # int32
        amin = jnp.min(first, axis=1, keepdims=True)           # first argmin
        sel = col == amin
        adj = adj + sel.astype(jnp.float32)
        r = jnp.where(sel, _BIG, r)
    return adj.astype(jnp.bfloat16), xb


def _graphconv(adj_bf16, xb, wr, wn, b):
    # out = x @ Wr + (A @ x) @ Wn + b   (two independent MXU matmuls; no
    # lane-axis concat / relayout copy)
    agg = lax.dot_general(adj_bf16, xb, (((1,), (0,)), ((), ())),
                          preferred_element_type=jnp.float32)
    z = lax.dot_general(xb, wr, (((1,), (0,)), ((), ())),
                        preferred_element_type=jnp.float32)
    z = z + lax.dot_general(agg.astype(jnp.bfloat16), wn, (((1,), (0,)), ((), ())),
                            preferred_element_type=jnp.float32)
    return z + b


def _graph_stage_kernel(x_ref, wr_ref, wn_ref, b_ref, o_ref, *, k):
    adj, xb = _knn_adjacency(x_ref[...], k)
    o_ref[...] = _graphconv(adj, xb, wr_ref[...], wn_ref[...], b_ref[...])


def _graph_stage_bn_kernel(x_ref, wr_ref, wn_ref, b_ref, g_ref, be_ref,
                           z_ref, o_ref, *, k):
    # training: GraphConv + batch-stat BatchNorm1d fused; emits pre-BN z too
    adj, xb = _knn_adjacency(x_ref[...], k)
    z = _graphconv(adj, xb, wr_ref[...], wn_ref[...], b_ref[...])
    z_ref[...] = z
    mean = jnp.mean(z, axis=0, keepdims=True)
    var = jnp.mean(jnp.square(z - mean), axis=0, keepdims=True)
    o_ref[...] = (z - mean) * lax.rsqrt(var + BN_EPS) * g_ref[...] + be_ref[...]


def _graph_stage_cls_kernel(x_ref, wr_ref, wn_ref, b_ref, wc_ref, bc_ref,
                            o_ref, *, k):
    # training: GraphConv2 + classifier fused
    adj, xb = _knn_adjacency(x_ref[...], k)
    z = _graphconv(adj, xb, wr_ref[...], wn_ref[...], b_ref[...])
    o_ref[...] = lax.dot_general(z.astype(jnp.bfloat16), wc_ref[...],
                                 (((1,), (0,)), ((), ())),
                                 preferred_element_type=jnp.float32) + bc_ref[...]


def graph_stage(feat, wr, wn, b, *, k):
    B, F = feat.shape
    return pl.pallas_call(
        functools.partial(_graph_stage_kernel, k=k),
        out_shape=jax.ShapeDtypeStruct((B, F), jnp.float32),
        in_specs=[VMEM] * 4, out_specs=VMEM,
    )(feat, wr, wn, b)


def graph_stage_bn(feat, wr, wn, b, gamma, beta, *, k):
    B, F = feat.shape
    return pl.pallas_call(
        functools.partial(_graph_stage_bn_kernel, k=k),
        out_shape=(jax.ShapeDtypeStruct((B, F), jnp.float32),
                   jax.ShapeDtypeStruct((B, F), jnp.float32)),
        in_specs=[VMEM] * 6, out_specs=(VMEM, VMEM),
    )(feat, wr, wn, b, gamma, beta)


def graph_stage_cls(feat, wr, wn, b, wc, bc, *, k):
    B = feat.shape[0]
    N = wc.shape[1]
    return pl.pallas_call(
        functools.partial(_graph_stage_cls_kernel, k=k),
        out_shape=jax.ShapeDtypeStruct((B, N), jnp.float32),
        in_specs=[VMEM] * 6, out_specs=VMEM,
    )(feat, wr, wn, b, wc, bc)


# ----------------------------------------------------------------------------
# Full forward pass (mirrors Baseline_graphconv.forward)
# ----------------------------------------------------------------------------
def baseline_graphconv_forward(x_nchw, params, k, *, training=False):
    B, Cin, H, W = x_nchw.shape
    Cfeat = params["g1_wr"].shape[0]
    num_classes = params["cls_w"].shape[1]
    FP = _round_up(Cfeat, LANE)            # lane-dense feature width
    CLSP = _round_up(num_classes, LANE)    # lane-dense class width
    K = 9 * Cin
    KP = _round_up(K, 16)                  # bf16 sublane multiple only, NOT 128

    # ---- im2col in the wrapper: 9 shifted views stacked on the channel axis ----
    # TODO(synk): for a real backbone, expand the 3x3 taps in-kernel (halo'd
    #             spatial BlockSpec) instead of materializing im2col in HBM.
    x_nhwc = jnp.transpose(x_nchw, (0, 2, 3, 1))                  # NCHW -> NHWC
    x_pad = jnp.pad(x_nhwc, ((0, 0), (1, 1), (1, 1), (0, 0)))
    taps = [x_pad[:, kh:kh + H, kw:kw + W, :] for kh in range(3) for kw in range(3)]
    patches = jnp.concatenate(taps, axis=-1).reshape(B, H * W, K)
    patches = jnp.pad(patches, ((0, 0), (0, 0), (0, KP - K))).astype(jnp.bfloat16)

    conv_w = params["conv_w"].reshape(K, Cfeat)
    conv_w = jnp.pad(conv_w, ((0, KP - K), (0, FP - Cfeat))).astype(jnp.bfloat16)
    conv_b = jnp.pad(params["conv_b"], ((0, 0), (0, FP - Cfeat)))

    # global_feat = gap(relu(conv(x))).view(B, -1)   (padded lanes stay 0)
    global_feat = conv_relu_gap(patches, conv_w, conv_b, hw=H * W)   # (B, FP) f32

    # ---- parameter padding for the graph stages ----
    pad_sq = lambda w: jnp.pad(w, ((0, FP - Cfeat), (0, FP - Cfeat)))
    pad_row = lambda v, cv=0.0: jnp.pad(v, ((0, 0), (0, FP - Cfeat)), constant_values=cv)
    wr1, wn1 = pad_sq(params["g1_wr"]), pad_sq(params["g1_wn"])
    b1 = pad_row(params["g1_b"])
    gamma, beta = pad_row(params["bn_gamma"]), pad_row(params["bn_beta"])
    mean, var = pad_row(params["bn_mean"]), pad_row(params["bn_var"], 1.0)
    wr2 = pad_sq(params["g2_wr"]).astype(jnp.bfloat16)
    wn2 = pad_sq(params["g2_wn"]).astype(jnp.bfloat16)
    b2 = pad_row(params["g2_b"])

    if training:
        # stage 1: kNN + GraphConv + batch-stat BN fused (pre-BN z also emitted)
        z1, feat_bn = graph_stage_bn(global_feat,
                                     wr1.astype(jnp.bfloat16),
                                     wn1.astype(jnp.bfloat16),
                                     b1, gamma, beta, k=k)
        # TODO(synk): BatchNorm1d running_mean/running_var updates are not performed.
        # stage 2: kNN + GraphConv + classifier fused
        cls_w = jnp.pad(params["cls_w"],
                        ((0, FP - Cfeat), (0, CLSP - num_classes))).astype(jnp.bfloat16)
        cls_b = jnp.pad(params["cls_b"], ((0, 0), (0, CLSP - num_classes)))
        cls = graph_stage_cls(feat_bn, wr2, wn2, b2, cls_w, cls_b, k=k)
        return cls[:, :num_classes], z1[:, :Cfeat]

    # eval: fold BN(running stats) affine into graphc1's weights/bias -> no BN op
    scale = gamma * lax.rsqrt(var + BN_EPS)
    shift = beta - mean * scale
    feat_bn = graph_stage(global_feat,
                          (wr1 * scale).astype(jnp.bfloat16),
                          (wn1 * scale).astype(jnp.bfloat16),
                          b1 * scale + shift, k=k)
    feat_out = graph_stage(feat_bn, wr2, wn2, b2, k=k)
    return feat_out[:, :Cfeat]


# ----------------------------------------------------------------------------
# Deterministic parameter initialization + smoke test
# ----------------------------------------------------------------------------
def init_params(key, Cin, Cfeat, num_classes):
    ks = jax.random.split(key, 10)
    return {
        "conv_w": 0.1 * jax.random.normal(ks[0], (3, 3, Cin, Cfeat), jnp.float32),
        "conv_b": 0.1 * jax.random.normal(ks[1], (1, Cfeat), jnp.float32),
        "g1_wr": 0.1 * jax.random.normal(ks[2], (Cfeat, Cfeat), jnp.float32),
        "g1_wn": 0.1 * jax.random.normal(ks[3], (Cfeat, Cfeat), jnp.float32),
        "g1_b": jnp.zeros((1, Cfeat), jnp.float32),
        "bn_gamma": jnp.ones((1, Cfeat), jnp.float32),
        "bn_beta": jnp.zeros((1, Cfeat), jnp.float32),
        "bn_mean": jnp.zeros((1, Cfeat), jnp.float32),
        "bn_var": jnp.ones((1, Cfeat), jnp.float32),
        "g2_wr": 0.1 * jax.random.normal(ks[4], (Cfeat, Cfeat), jnp.float32),
        "g2_wn": 0.1 * jax.random.normal(ks[5], (Cfeat, Cfeat), jnp.float32),
        "g2_b": jnp.zeros((1, Cfeat), jnp.float32),
        "cls_w": 0.1 * jax.random.normal(ks[6], (Cfeat, num_classes), jnp.float32),
        "cls_b": jnp.zeros((1, num_classes), jnp.float32),
    }


if __name__ == "__main__":
    key = jax.random.PRNGKey(0)
    k_params, k_x = jax.random.split(key)

    B, Cin, H, W = 8, 4, 16, 16
    Cfeat, num_classes, edge_k = 32, 10, 3

    params = init_params(k_params, Cin, Cfeat, num_classes)
    x = jax.random.normal(k_x, (B, Cin, H, W), jnp.float32)       # NCHW like PyTorch

    fwd = jax.jit(baseline_graphconv_forward, static_argnames=("k", "training"))

    # eval path: returns feat_with_graph (B, Cfeat)
    feat_eval = fwd(x, params, k=edge_k, training=False)
    # training path: returns (cls_score, global_feat_with_graph)
    cls_score, gfeat = fwd(x, params, k=edge_k, training=True)

    jax.block_until_ready((feat_eval, cls_score, gfeat))
    assert feat_eval.shape == (B, Cfeat)
    assert cls_score.shape == (B, num_classes)
    assert gfeat.shape == (B, Cfeat)
    print("KERNEL_OK")
</pallas_src>

<mosaic_0001>
module attributes {stable_mosaic.version = 11 : i64} {
  func.func @_conv_gap_kernel(%arg0: i32, %arg1: i32, %arg2: memref<4x64x48xbf16, #tpu.memory_space<vmem>>, %arg3: memref<48x128xbf16, #tpu.memory_space<vmem>>, %arg4: memref<1x128xf32, #tpu.memory_space<vmem>>, %arg5: memref<1x4x128xf32, #tpu.memory_space<vmem>>) attributes {dimension_semantics = [#tpu.dimension_semantics<parallel>, #tpu.dimension_semantics<arbitrary>], iteration_bounds = array<i64: 2, 4>, scalar_prefetch = 0 : i64, scratch_operands = 0 : i64, tpu.core_type = #tpu.core_type<tc>, window_params = [{transform_indices = @transform_0, window_bounds = array<i64: 4, 64, 48>}, {pipeline_mode = #tpu.pipeline_mode<synchronous>, transform_indices = @transform_1, window_bounds = array<i64: 48, 128>}, {pipeline_mode = #tpu.pipeline_mode<synchronous>, transform_indices = @transform_2, window_bounds = array<i64: 1, 128>}, {transform_indices = @transform_3, window_bounds = array<i64: 1, 4, 128>}]} {
    %c0_i32 = arith.constant 0 : i32
    %0 = arith.cmpi eq, %arg1, %c0_i32 : i32
    %1 = arith.extui %0 : i1 to i32
    %c0_i32_0 = arith.constant 0 : i32
    %2 = arith.cmpi ne, %1, %c0_i32_0 : i32
    scf.if %2 {
      %cst_26 = arith.constant 0.000000e+00 : f32
      %37 = vector.broadcast %cst_26 : f32 to vector<4x128xf32>
      %c0_27 = arith.constant 0 : index
      %c0_28 = arith.constant 0 : index
      %c0_29 = arith.constant 0 : index
      %38 = vector.load %arg5[%c0_27, %c0_28, %c0_29] : memref<1x4x128xf32, #tpu.memory_space<vmem>>, vector<1x4x128xf32>
      %39 = vector.shape_cast %38 : vector<1x4x128xf32> to vector<4x128xf32>
      %40 = vector.shape_cast %37 : vector<4x128xf32> to vector<1x4x128xf32>
      tpu.vector_store %arg5[%c0_27, %c0_28, %c0_29], %40 {strides = array<i32>} : memref<1x4x128xf32, #tpu.memory_space<vmem>>, vector<1x4x128xf32>,
    } else {
    }
    %cst = arith.constant 0.000000e+00 : f32
    %3 = vector.broadcast %cst : f32 to vector<4x128xf32>
    %c0 = arith.constant 0 : index
    %c0_1 = arith.constant 0 : index
    %c0_2 = arith.constant 0 : index
    %4 = vector.load %arg2[%c0, %c0_1, %c0_2] : memref<4x64x48xbf16, #tpu.memory_space<vmem>>, vector<4x32x48xbf16>
    %5 = vector.shape_cast %4 : vector<4x32x48xbf16> to vector<128x48xbf16>
    %c0_3 = arith.constant 0 : index
    %c0_4 = arith.constant 0 : index
    %6 = vector.load %arg3[%c0_3, %c0_4] : memref<48x128xbf16, #tpu.memory_space<vmem>>, vector<48x128xbf16>
    %cst_5 = arith.constant dense<0.000000e+00> : vector<128x128xf32>
    %7 = tpu.matmul %5, %6, %cst_5 {dimension_numbers = #tpu.dot_dimension_numbers<[1], [0], [0], [1], [0, 0, 1, 1], [], []>} : vector<128x48xbf16>, vector<48x128xbf16>, vector<128x128xf32> -> vector<128x128xf32>
    %c0_6 = arith.constant 0 : index
    %c0_7 = arith.constant 0 : index
    %8 = vector.load %arg4[%c0_6, %c0_7] : memref<1x128xf32, #tpu.memory_space<vmem>>, vector<1x128xf32>
    %9 = vector.broadcast %8 : vector<1x128xf32> to vector<128x128xf32>
    %10 = arith.addf %7, %9 : vector<128x128xf32>
    %cst_8 = arith.constant 0.000000e+00 : f32
    %11 = vector.broadcast %cst_8 : f32 to vector<128x128xf32>
    %12 = arith.maximumf %10, %11 : vector<128x128xf32>
    %13 = vector.shape_cast %12 : vector<128x128xf32> to vector<4x32x128xf32>
    %cst_9 = arith.constant dense<0.000000e+00> : vector<4x128xf32>
    %14 = vector.multi_reduction <add>, %13, %cst_9 [1] : vector<4x32x128xf32> to vector<4x128xf32>
    %15 = arith.addf %3, %14 : vector<4x128xf32>
    %c0_10 = arith.constant 0 : index
    %c32 = arith.constant 32 : index
    %c0_11 = arith.constant 0 : index
    %16 = vector.load %arg2[%c0_10, %c32, %c0_11] : memref<4x64x48xbf16, #tpu.memory_space<vmem>>, vector<4x32x48xbf16>
    %17 = vector.shape_cast %16 : vector<4x32x48xbf16> to vector<128x48xbf16>
    %c0_12 = arith.constant 0 : index
    %c0_13 = arith.constant 0 : index
    %18 = vector.load %arg3[%c0_12, %c0_13] : memref<48x128xbf16, #tpu.memory_space<vmem>>, vector<48x128xbf16>
    %cst_14 = arith.constant dense<0.000000e+00> : vector<128x128xf32>
    %19 = tpu.matmul %17, %18, %cst_14 {dimension_numbers = #tpu.dot_dimension_numbers<[1], [0], [0], [1], [0, 0, 1, 1], [], []>} : vector<128x48xbf16>, vector<48x128xbf16>, vector<128x128xf32> -> vector<128x128xf32>
    %c0_15 = arith.constant 0 : index
    %c0_16 = arith.constant 0 : index
    %20 = vector.load %arg4[%c0_15, %c0_16] : memref<1x128xf32, #tpu.memory_space<vmem>>, vector<1x128xf32>
    %21 = vector.broadcast %20 : vector<1x128xf32> to vector<128x128xf32>
    %22 = arith.addf %19, %21 : vector<128x128xf32>
    %cst_17 = arith.constant 0.000000e+00 : f32
    %23 = vector.broadcast %cst_17 : f32 to vector<128x128xf32>
    %24 = arith.maximumf %22, %23 : vector<128x128xf32>
    %25 = vector.shape_cast %24 : vector<128x128xf32> to vector<4x32x128xf32>
    %cst_18 = arith.constant dense<0.000000e+00> : vector<4x128xf32>
    %26 = vector.multi_reduction <add>, %25, %cst_18 [1] : vector<4x32x128xf32> to vector<4x128xf32>
    %27 = arith.addf %15, %26 : vector<4x128xf32>
    %c0_19 = arith.constant 0 : index
    %c0_20 = arith.constant 0 : index
    %c0_21 = arith.constant 0 : index
    %28 = vector.load %arg5[%c0_19, %c0_20, %c0_21] : memref<1x4x128xf32, #tpu.memory_space<vmem>>, vector<1x4x128xf32>
    %29 = vector.shape_cast %28 : vector<1x4x128xf32> to vector<4x128xf32>
    %30 = arith.addf %29, %27 : vector<4x128xf32>
    %c0_22 = arith.constant 0 : index
    %c0_23 = arith.constant 0 : index
    %c0_24 = arith.constant 0 : index
    %31 = vector.load %arg5[%c0_22, %c0_23, %c0_24] : memref<1x4x128xf32, #tpu.memory_space<vmem>>, vector<1x4x128xf32>
    %32 = vector.shape_cast %31 : vector<1x4x128xf32> to vector<4x128xf32>
    %33 = vector.shape_cast %30 : vector<4x128xf32> to vector<1x4x128xf32>
    tpu.vector_store %arg5[%c0_22, %c0_23, %c0_24], %33 {strides = array<i32>} : memref<1x4x128xf32, #tpu.memory_space<vmem>>, vector<1x4x128xf32>,
    %c3_i32 = arith.constant 3 : i32
    %34 = arith.cmpi eq, %arg1, %c3_i32 : i32
    %35 = arith.extui %34 : i1 to i32
    %c0_i32_25 = arith.constant 0 : i32
    %36 = arith.cmpi ne, %35, %c0_i32_25 : i32
    scf.if %36 {
      %c0_26 = arith.constant 0 : index
      %c0_27 = arith.constant 0 : index
      %c0_28 = arith.constant 0 : index
      %37 = vector.load %arg5[%c0_26, %c0_27, %c0_28] : memref<1x4x128xf32, #tpu.memory_space<vmem>>, vector<1x4x128xf32>
      %38 = vector.shape_cast %37 : vector<1x4x128xf32> to vector<4x128xf32>
      %cst_29 = arith.constant 3.906250e-03 : f32
      %39 = vector.broadcast %cst_29 : f32 to vector<4x128xf32>
      %40 = arith.mulf %38, %39 : vector<4x128xf32>
      %c0_30 = arith.constant 0 : index
      %c0_31 = arith.constant 0 : index
      %c0_32 = arith.constant 0 : index
      %41 = vector.load %arg5[%c0_30, %c0_31, %c0_32] : memref<1x4x128xf32, #tpu.memory_space<vmem>>, vector<1x4x128xf32>
      %42 = vector.shape_cast %41 : vector<1x4x128xf32> to vector<4x128xf32>
      %43 = vector.shape_cast %40 : vector<4x128xf32> to vector<1x4x128xf32>
      tpu.vector_store %arg5[%c0_30, %c0_31, %c0_32], %43 {strides = array<i32>} : memref<1x4x128xf32, #tpu.memory_space<vmem>>, vector<1x4x128xf32>,
    } else {
    }
    return
  }
  func.func @transform_0(%arg0: i32, %arg1: i32) -> (i32, i32, i32) {
    %c0_i32 = arith.constant 0 : i32
    %c0_i32_0 = arith.constant 0 : i32
    return %arg0, %arg1, %c0_i32 : i32, i32, i32
  }
  func.func @transform_1(%arg0: i32, %arg1: i32) -> (i32, i32) {
    %c0_i32 = arith.constant 0 : i32
    %c0_i32_0 = arith.constant 0 : i32
    %c0_i32_1 = arith.constant 0 : i32
    return %c0_i32, %c0_i32_0 : i32, i32
  }
  func.func @transform_2(%arg0: i32, %arg1: i32) -> (i32, i32) {
    %c0_i32 = arith.constant 0 : i32
    %c0_i32_0 = arith.constant 0 : i32
    %c0_i32_1 = arith.constant 0 : i32
    return %c0_i32, %c0_i32_0 : i32, i32
  }
  func.func @transform_3(%arg0: i32, %arg1: i32) -> (i32, i32, i32) {
    %c0_i32 = arith.constant 0 : i32
    %c0_i32_0 = arith.constant 0 : i32
    %c0_i32_1 = arith.constant 0 : i32
    return %arg0, %c0_i32, %c0_i32_0 : i32, i32, i32
  }
}

module attributes {stable_mosaic.version = 11 : i64} {
  func.func @_graph_stage_kernel(%arg0: memref<8x128xf32, #tpu.memory_space<vmem>>, %arg1: memref<128x128xbf16, #tpu.memory_space<vmem>>, %arg2: memref<128x128xbf16, #tpu.memory_space<vmem>>, %arg3: memref<1x128xf32, #tpu.memory_space<vmem>>, %arg4: memref<8x128xf32, #tpu.memory_space<vmem>>) attributes {dimension_semantics = [], scalar_prefetch = 0 : i64, scratch_operands = 0 : i64, tpu.core_type = #tpu.core_type<tc>} {
    %c0 = arith.constant 0 : index
    %c0_0 = arith.constant 0 : index
    %0 = vector.load %arg0[%c0, %c0_0] : memref<8x128xf32, #tpu.memory_space<vmem>>, vector<8x128xf32>
    %1 = arith.truncf %0 : vector<8x128xf32> to vector<8x128xbf16>
    %cst = arith.constant dense<0.000000e+00> : vector<8x8xf32>
    %2 = tpu.matmul %1, %1, %cst {dimension_numbers = #tpu.dot_dimension_numbers<[1], [1], [0], [0], [0, 0, 1, 0], [], []>} : vector<8x128xbf16>, vector<8x128xbf16>, vector<8x8xf32> -> vector<8x8xf32>
    %3 = tpu.iota {dimensions = array<i32: 0>} : vector<8x8xi32>
    %4 = tpu.iota {dimensions = array<i32: 1>} : vector<8x8xi32>
    %5 = arith.cmpi eq, %3, %4 : vector<8x8xi32>
    %cst_1 = arith.constant 0.000000e+00 : f32
    %6 = vector.broadcast %cst_1 : f32 to vector<8x8xf32>
    %7 = arith.select %5, %2, %6 : vector<8x8xi1>, vector<8x8xf32>
    %cst_2 = arith.constant dense<0.000000e+00> : vector<8xf32>
    %8 = vector.multi_reduction <add>, %7, %cst_2 [0] : vector<8x8xf32> to vector<8xf32>
    %9 = vector.shape_cast %8 : vector<8xf32> to vector<1x8xf32>
    %cst_3 = arith.constant 2.000000e+00 : f32
    %10 = vector.broadcast %cst_3 : f32 to vector<8x8xf32>
    %11 = arith.mulf %10, %2 : vector<8x8xf32>
    %12 = vector.broadcast %9 : vector<1x8xf32> to vector<8x8xf32>
    %13 = arith.subf %12, %11 : vector<8x8xf32>
    %cst_4 = arith.constant 1.000000e+30 : f32
    %14 = vector.broadcast %cst_4 : f32 to vector<8x8xf32>
    %15 = arith.select %5, %14, %13 : vector<8x8xi1>, vector<8x8xf32>
    %cst_5 = arith.constant 0.000000e+00 : f32
    %16 = vector.broadcast %cst_5 : f32 to vector<8x8xf32>
    %cst_6 = arith.constant dense<0x7F800000> : vector<8xf32>
    %17 = vector.multi_reduction <minimumf>, %15, %cst_6 [1] : vector<8x8xf32> to vector<8xf32>
    %18 = vector.shape_cast %17 : vector<8xf32> to vector<8x1xf32>
    %19 = vector.broadcast %18 : vector<8x1xf32> to vector<8x8xf32>
    %20 = arith.cmpf oeq, %15, %19 : vector<8x8xf32>
    %c8_i32 = arith.constant 8 : i32
    %21 = vector.broadcast %c8_i32 : i32 to vector<8x8xi32>
    %22 = arith.select %20, %4, %21 : vector<8x8xi1>, vector<8x8xi32>
    %cst_7 = arith.constant dense<2147483647> : vector<8xi32>
    %23 = vector.multi_reduction <minsi>, %22, %cst_7 [1] : vector<8x8xi32> to vector<8xi32>
    %24 = vector.shape_cast %23 : vector<8xi32> to vector<8x1xi32>
    %25 = vector.broadcast %24 : vector<8x1xi32> to vector<8x8xi32>
    %26 = arith.cmpi eq, %4, %25 : vector<8x8xi32>
    %27 = arith.extui %26 : vector<8x8xi1> to vector<8x8xi32>
    %28 = arith.sitofp %27 : vector<8x8xi32> to vector<8x8xf32>
    %29 = arith.addf %16, %28 : vector<8x8xf32>
    %cst_8 = arith.constant 1.000000e+30 : f32
    %30 = vector.broadcast %cst_8 : f32 to vector<8x8xf32>
    %31 = arith.select %26, %30, %15 : vector<8x8xi1>, vector<8x8xf32>
    %cst_9 = arith.constant dense<0x7F800000> : vector<8xf32>
    %32 = vector.multi_reduction <minimumf>, %31, %cst_9 [1] : vector<8x8xf32> to vector<8xf32>
    %33 = vector.shape_cast %32 : vector<8xf32> to vector<8x1xf32>
    %34 = vector.broadcast %33 : vector<8x1xf32> to vector<8x8xf32>
    %35 = arith.cmpf oeq, %31, %34 : vector<8x8xf32>
    %c8_i32_10 = arith.constant 8 : i32
    %36 = vector.broadcast %c8_i32_10 : i32 to vector<8x8xi32>
    %37 = arith.select %35, %4, %36 : vector<8x8xi1>, vector<8x8xi32>
    %cst_11 = arith.constant dense<2147483647> : vector<8xi32>
    %38 = vector.multi_reduction <minsi>, %37, %cst_11 [1] : vector<8x8xi32> to vector<8xi32>
    %39 = vector.shape_cast %38 : vector<8xi32> to vector<8x1xi32>
    %40 = vector.broadcast %39 : vector<8x1xi32> to vector<8x8xi32>
    %41 = arith.cmpi eq, %4, %40 : vector<8x8xi32>
    %42 = arith.extui %41 : vector<8x8xi1> to vector<8x8xi32>
    %43 = arith.sitofp %42 : vector<8x8xi32> to vector<8x8xf32>
    %44 = arith.addf %29, %43 : vector<8x8xf32>
    %cst_12 = arith.constant 1.000000e+30 : f32
    %45 = vector.broadcast %cst_12 : f32 to vector<8x8xf32>
    %46 = arith.select %41, %45, %31 : vector<8x8xi1>, vector<8x8xf32>
    %cst_13 = arith.constant dense<0x7F800000> : vector<8xf32>
    %47 = vector.multi_reduction <minimumf>, %46, %cst_13 [1] : vector<8x8xf32> to vector<8xf32>
    %48 = vector.shape_cast %47 : vector<8xf32> to vector<8x1xf32>
    %49 = vector.broadcast %48 : vector<8x1xf32> to vector<8x8xf32>
    %50 = arith.cmpf oeq, %46, %49 : vector<8x8xf32>
    %c8_i32_14 = arith.constant 8 : i32
    %51 = vector.broadcast %c8_i32_14 : i32 to vector<8x8xi32>
    %52 = arith.select %50, %4, %51 : vector<8x8xi1>, vector<8x8xi32>
    %cst_15 = arith.constant dense<2147483647> : vector<8xi32>
    %53 = vector.multi_reduction <minsi>, %52, %cst_15 [1] : vector<8x8xi32> to vector<8xi32>
    %54 = vector.shape_cast %53 : vector<8xi32> to vector<8x1xi32>
    %55 = vector.broadcast %54 : vector<8x1xi32> to vector<8x8xi32>
    %56 = arith.cmpi eq, %4, %55 : vector<8x8xi32>
    %57 = arith.extui %56 : vector<8x8xi1> to vector<8x8xi32>
    %58 = arith.sitofp %57 : vector<8x8xi32> to vector<8x8xf32>
    %59 = arith.addf %44, %58 : vector<8x8xf32>
    %60 = arith.truncf %59 : vector<8x8xf32> to vector<8x8xbf16>
    %c0_16 = arith.constant 0 : index
    %c0_17 = arith.constant 0 : index
    %61 = vector.load %arg1[%c0_16, %c0_17] : memref<128x128xbf16, #tpu.memory_space<vmem>>, vector<128x128xbf16>
    %c0_18 = arith.constant 0 : index
    %c0_19 = arith.constant 0 : index
    %62 = vector.load %arg2[%c0_18, %c0_19] : memref<128x128xbf16, #tpu.memory_space<vmem>>, vector<128x128xbf16>
    %c0_20 = arith.constant 0 : index
    %c0_21 = arith.constant 0 : index
    %63 = vector.load %arg3[%c0_20, %c0_21] : memref<1x128xf32, #tpu.memory_space<vmem>>, vector<1x128xf32>
    %cst_22 = arith.constant dense<0.000000e+00> : vector<8x128xf32>
    %64 = tpu.matmul %60, %1, %cst_22 {dimension_numbers = #tpu.dot_dimension_numbers<[1], [0], [0], [1], [0, 0, 1, 1], [], []>} : vector<8x8xbf16>, vector<8x128xbf16>, vector<8x128xf32> -> vector<8x128xf32>
    %cst_23 = arith.constant dense<0.000000e+00> : vector<8x128xf32>
    %65 = tpu.matmul %1, %61, %cst_23 {dimension_numbers = #tpu.dot_dimension_numbers<[1], [0], [0], [1], [0, 0, 1, 1], [], []>} : vector<8x128xbf16>, vector<128x128xbf16>, vector<8x128xf32> -> vector<8x128xf32>
    %66 = arith.truncf %64 : vector<8x128xf32> to vector<8x128xbf16>
    %cst_24 = arith.constant dense<0.000000e+00> : vector<8x128xf32>
    %67 = tpu.matmul %66, %62, %cst_24 {dimension_numbers = #tpu.dot_dimension_numbers<[1], [0], [0], [1], [0, 0, 1, 1], [], []>} : vector<8x128xbf16>, vector<128x128xbf16>, vector<8x128xf32> -> vector<8x128xf32>
    %68 = arith.addf %65, %67 : vector<8x128xf32>
    %69 = vector.broadcast %63 : vector<1x128xf32> to vector<8x128xf32>
    %70 = arith.addf %68, %69 : vector<8x128xf32>
    %c0_25 = arith.constant 0 : index
    %c0_26 = arith.constant 0 : index
    %71 = vector.load %arg4[%c0_25, %c0_26] : memref<8x128xf32, #tpu.memory_space<vmem>>, vector<8x128xf32>
    tpu.vector_store %arg4[%c0_25, %c0_26], %70 {strides = array<i32>} : memref<8x128xf32, #tpu.memory_space<vmem>>, vector<8x128xf32>,
    return
  }
}

module attributes {stable_mosaic.version = 11 : i64} {
  func.func @_graph_stage_kernel(%arg0: memref<8x128xf32, #tpu.memory_space<vmem>>, %arg1: memref<128x128xbf16, #tpu.memory_space<vmem>>, %arg2: memref<128x128xbf16, #tpu.memory_space<vmem>>, %arg3: memref<1x128xf32, #tpu.memory_space<vmem>>, %arg4: memref<8x128xf32, #tpu.memory_space<vmem>>) attributes {dimension_semantics = [], scalar_prefetch = 0 : i64, scratch_operands = 0 : i64, tpu.core_type = #tpu.core_type<tc>} {
    %c0 = arith.constant 0 : index
    %c0_0 = arith.constant 0 : index
    %0 = vector.load %arg0[%c0, %c0_0] : memref<8x128xf32, #tpu.memory_space<vmem>>, vector<8x128xf32>
    %1 = arith.truncf %0 : vector<8x128xf32> to vector<8x128xbf16>
    %cst = arith.constant dense<0.000000e+00> : vector<8x8xf32>
    %2 = tpu.matmul %1, %1, %cst {dimension_numbers = #tpu.dot_dimension_numbers<[1], [1], [0], [0], [0, 0, 1, 0], [], []>} : vector<8x128xbf16>, vector<8x128xbf16>, vector<8x8xf32> -> vector<8x8xf32>
    %3 = tpu.iota {dimensions = array<i32: 0>} : vector<8x8xi32>
    %4 = tpu.iota {dimensions = array<i32: 1>} : vector<8x8xi32>
    %5 = arith.cmpi eq, %3, %4 : vector<8x8xi32>
    %cst_1 = arith.constant 0.000000e+00 : f32
    %6 = vector.broadcast %cst_1 : f32 to vector<8x8xf32>
    %7 = arith.select %5, %2, %6 : vector<8x8xi1>, vector<8x8xf32>
    %cst_2 = arith.constant dense<0.000000e+00> : vector<8xf32>
    %8 = vector.multi_reduction <add>, %7, %cst_2 [0] : vector<8x8xf32> to vector<8xf32>
    %9 = vector.shape_cast %8 : vector<8xf32> to vector<1x8xf32>
    %cst_3 = arith.constant 2.000000e+00 : f32
    %10 = vector.broadcast %cst_3 : f32 to vector<8x8xf32>
    %11 = arith.mulf %10, %2 : vector<8x8xf32>
    %12 = vector.broadcast %9 : vector<1x8xf32> to vector<8x8xf32>
    %13 = arith.subf %12, %11 : vector<8x8xf32>
    %cst_4 = arith.constant 1.000000e+30 : f32
    %14 = vector.broadcast %cst_4 : f32 to vector<8x8xf32>
    %15 = arith.select %5, %14, %13 : vector<8x8xi1>, vector<8x8xf32>
    %cst_5 = arith.constant 0.000000e+00 : f32
    %16 = vector.broadcast %cst_5 : f32 to vector<8x8xf32>
    %cst_6 = arith.constant dense<0x7F800000> : vector<8xf32>
    %17 = vector.multi_reduction <minimumf>, %15, %cst_6 [1] : vector<8x8xf32> to vector<8xf32>
    %18 = vector.shape_cast %17 : vector<8xf32> to vector<8x1xf32>
    %19 = vector.broadcast %18 : vector<8x1xf32> to vector<8x8xf32>
    %20 = arith.cmpf oeq, %15, %19 : vector<8x8xf32>
    %c8_i32 = arith.constant 8 : i32
    %21 = vector.broadcast %c8_i32 : i32 to vector<8x8xi32>
    %22 = arith.select %20, %4, %21 : vector<8x8xi1>, vector<8x8xi32>
    %cst_7 = arith.constant dense<2147483647> : vector<8xi32>
    %23 = vector.multi_reduction <minsi>, %22, %cst_7 [1] : vector<8x8xi32> to vector<8xi32>
    %24 = vector.shape_cast %23 : vector<8xi32> to vector<8x1xi32>
    %25 = vector.broadcast %24 : vector<8x1xi32> to vector<8x8xi32>
    %26 = arith.cmpi eq, %4, %25 : vector<8x8xi32>
    %27 = arith.extui %26 : vector<8x8xi1> to vector<8x8xi32>
    %28 = arith.sitofp %27 : vector<8x8xi32> to vector<8x8xf32>
    %29 = arith.addf %16, %28 : vector<8x8xf32>
    %cst_8 = arith.constant 1.000000e+30 : f32
    %30 = vector.broadcast %cst_8 : f32 to vector<8x8xf32>
    %31 = arith.select %26, %30, %15 : vector<8x8xi1>, vector<8x8xf32>
    %cst_9 = arith.constant dense<0x7F800000> : vector<8xf32>
    %32 = vector.multi_reduction <minimumf>, %31, %cst_9 [1] : vector<8x8xf32> to vector<8xf32>
    %33 = vector.shape_cast %32 : vector<8xf32> to vector<8x1xf32>
    %34 = vector.broadcast %33 : vector<8x1xf32> to vector<8x8xf32>
    %35 = arith.cmpf oeq, %31, %34 : vector<8x8xf32>
    %c8_i32_10 = arith.constant 8 : i32
    %36 = vector.broadcast %c8_i32_10 : i32 to vector<8x8xi32>
    %37 = arith.select %35, %4, %36 : vector<8x8xi1>, vector<8x8xi32>
    %cst_11 = arith.constant dense<2147483647> : vector<8xi32>
    %38 = vector.multi_reduction <minsi>, %37, %cst_11 [1] : vector<8x8xi32> to vector<8xi32>
    %39 = vector.shape_cast %38 : vector<8xi32> to vector<8x1xi32>
    %40 = vector.broadcast %39 : vector<8x1xi32> to vector<8x8xi32>
    %41 = arith.cmpi eq, %4, %40 : vector<8x8xi32>
    %42 = arith.extui %41 : vector<8x8xi1> to vector<8x8xi32>
    %43 = arith.sitofp %42 : vector<8x8xi32> to vector<8x8xf32>
    %44 = arith.addf %29, %43 : vector<8x8xf32>
    %cst_12 = arith.constant 1.000000e+30 : f32
    %45 = vector.broadcast %cst_12 : f32 to vector<8x8xf32>
    %46 = arith.select %41, %45, %31 : vector<8x8xi1>, vector<8x8xf32>
    %cst_13 = arith.constant dense<0x7F800000> : vector<8xf32>
    %47 = vector.multi_reduction <minimumf>, %46, %cst_13 [1] : vector<8x8xf32> to vector<8xf32>
    %48 = vector.shape_cast %47 : vector<8xf32> to vector<8x1xf32>
    %49 = vector.broadcast %48 : vector<8x1xf32> to vector<8x8xf32>
    %50 = arith.cmpf oeq, %46, %49 : vector<8x8xf32>
    %c8_i32_14 = arith.constant 8 : i32
    %51 = vector.broadcast %c8_i32_14 : i32 to vector<8x8xi32>
    %52 = arith.select %50, %4, %51 : vector<8x8xi1>, vector<8x8xi32>
    %cst_15 = arith.constant dense<2147483647> : vector<8xi32>
    %53 = vector.multi_reduction <minsi>, %52, %cst_15 [1] : vector<8x8xi32> to vector<8xi32>
    %54 = vector.shape_cast %53 : vector<8xi32> to vector<8x1xi32>
    %55 = vector.broadcast %54 : vector<8x1xi32> to vector<8x8xi32>
    %56 = arith.cmpi eq, %4, %55 : vector<8x8xi32>
    %57 = arith.extui %56 : vector<8x8xi1> to vector<8x8xi32>
    %58 = arith.sitofp %57 : vector<8x8xi32> to vector<8x8xf32>
    %59 = arith.addf %44, %58 : vector<8x8xf32>
    %60 = arith.truncf %59 : vector<8x8xf32> to vector<8x8xbf16>
    %c0_16 = arith.constant 0 : index
    %c0_17 = arith.constant 0 : index
    %61 = vector.load %arg1[%c0_16, %c0_17] : memref<128x128xbf16, #tpu.memory_space<vmem>>, vector<128x128xbf16>
    %c0_18 = arith.constant 0 : index
    %c0_19 = arith.constant 0 : index
    %62 = vector.load %arg2[%c0_18, %c0_19] : memref<128x128xbf16, #tpu.memory_space<vmem>>, vector<128x128xbf16>
    %c0_20 = arith.constant 0 : index
    %c0_21 = arith.constant 0 : index
    %63 = vector.load %arg3[%c0_20, %c0_21] : memref<1x128xf32, #tpu.memory_space<vmem>>, vector<1x128xf32>
    %cst_22 = arith.constant dense<0.000000e+00> : vector<8x128xf32>
    %64 = tpu.matmul %60, %1, %cst_22 {dimension_numbers = #tpu.dot_dimension_numbers<[1], [0], [0], [1], [0, 0, 1, 1], [], []>} : vector<8x8xbf16>, vector<8x128xbf16>, vector<8x128xf32> -> vector<8x128xf32>
    %cst_23 = arith.constant dense<0.000000e+00> : vector<8x128xf32>
    %65 = tpu.matmul %1, %61, %cst_23 {dimension_numbers = #tpu.dot_dimension_numbers<[1], [0], [0], [1], [0, 0, 1, 1], [], []>} : vector<8x128xbf16>, vector<128x128xbf16>, vector<8x128xf32> -> vector<8x128xf32>
    %66 = arith.truncf %64 : vector<8x128xf32> to vector<8x128xbf16>
    %cst_24 = arith.constant dense<0.000000e+00> : vector<8x128xf32>
    %67 = tpu.matmul %66, %62, %cst_24 {dimension_numbers = #tpu.dot_dimension_numbers<[1], [0], [0], [1], [0, 0, 1, 1], [], []>} : vector<8x128xbf16>, vector<128x128xbf16>, vector<8x128xf32> -> vector<8x128xf32>
    %68 = arith.addf %65, %67 : vector<8x128xf32>
    %69 = vector.broadcast %63 : vector<1x128xf32> to vector<8x128xf32>
    %70 = arith.addf %68, %69 : vector<8x128xf32>
    %c0_25 = arith.constant 0 : index
    %c0_26 = arith.constant 0 : index
    %71 = vector.load %arg4[%c0_25, %c0_26] : memref<8x128xf32, #tpu.memory_space<vmem>>, vector<8x128xf32>
    tpu.vector_store %arg4[%c0_25, %c0_26], %70 {strides = array<i32>} : memref<8x128xf32, #tpu.memory_space<vmem>>, vector<8x128xf32>,
    return
  }
}

</mosaic_0001>

<bundles_post_ra>
// kernel: baseline_graphconv_forward.3
= control target key start
LH: loop header
LB: loop body
LE: loop exit
PB: predicated region body
PF: predicated region fallthrough
CT: control target
= control target key end

     0   :  { %s1224_s12 = smov 0   ;;  %s1226_s13 = smov 0   ;;  %s1421_s0 = inlined_call_operand.vmem [shape: bf16[8,256,48], index: 0, kind: input, shape index: {}]   ;;  %s1422_s1 = inlined_call_operand.vmem [shape: bf16[48,128], index: 1, kind: input, shape index: {}]   ;;  %s1423_s2 = inlined_call_operand.vmem [shape: f32[1,128], index: 2, kind: input, shape index: {}]   ;;  %s1424_s3 = inlined_call_operand.vmem [shape: f32[2,4,128], index: 3, kind: output, shape index: {}]  }
   0x1   :  { %s1228_s14 = smov 0   ;;  %s1230_s15 = smov 0  }
   0x2   :  { %s1232_s16 = smov 0   ;;  %s1234_s17 = smov 0  }
   0x3   :  { %s1236_s18 = smov 0  }
   0x4 LB: > { %s22_s19 = sadd.s32 1, %s1193_s16  ;;  %s25_s20 = sadd.s32 1, %s1197_s17  ;;  %s1201_s18 = sphi %s1236_s18, %s13_s18   ;;  %s1197_s17 = sphi %s1234_s17, %s1430_s17   ;;  %s1193_s16 = sphi %s1232_s16, %s1429_s16   ;;  %s1189_s15 = sphi %s1230_s15, %s1428_s15   ;;  %s1185_s14 = sphi %s1228_s14, %s1427_s14   ;;  %s1181_s13 = sphi %s1226_s13, %s1426_s13   ;;  %s1177_s12 = sphi %s1224_s12, %s1425_s12  }
   0x5   : > { %p23_p0 = scmp.ge.s32.totalorder %s22_s19, 4  ;;  %p41_p1 = scmp.ne.s32.totalorder %s1181_s13, %s1177_s12 }
   0x6   : > { %p42_p2 = scmp.eq.s32.totalorder %s1201_s18, 0  ;;  %s34_s24 = sadd.s32 1, %s1181_s13 }
   0x7   : > { %s1432_s19 = smov (%p23_p0, %s22_s19), 0  ;;  %s1434_s20 = smov (!%p23_p0, %s25_s20), %s1197_s17 }
   0x8   : > { %p43_p3 = por %p42_p2, %p41_p1  ;;  %p27_p4 = scmp.ge.s32.totalorder %s1434_s20, 2 }
   0x9   : > { %s30_s21 = ssub.s32 %s1193_s16, %s1432_s19  ;;  %p955_p6 = scmp.ge.s32.totalorder %s1201_s18, 8 }
   0xa   : > { %s1436_s20 = smov (%p27_p4, %s1434_s20), 0 }
   0xb   : > { %s29_s22 = ssub.s32 %s1197_s17, %s1436_s20  ;;  %141 = sbr.rel (%p955_p6) target bundleno = 33 (0x21), region = 24 }
   0xc   : > { %s31_s23 = sor.u32 %s30_s21, %s29_s22 }
   0xd   : > { %p32_p5 = scmp.eq.s32.totalorder %s31_s23, 0 }
   0xf   : > { %s1275_s25 = scalar_select %p32_p5, %s1181_s13, %s34_s24  }
  0x12   : > { %144 = sbr.rel (!%p43_p3) target bundleno = 33 (0x21), region = 28  ;;  %s146_s26 = sand.u32 (%p43_p3), 1, %s1181_s13  }
  0x13   : > { %s958_s27 = sshll.u32 (%p43_p3), %s1193_s16, 3  ;;  %s956_s28 = sshll.u32 (%p43_p3), %s146_s26, 7 }
  0x14   : > { %s1004_s29 = sshll.u32 (%p43_p3), %s1197_s17, 7  ;;  %s148_s8 = scalar_lea.vmem (%p43_p3), [#allocation2], %s956_s28 }
  0x15   : > { %s152_s30 = sadd.s32 (%p43_p3), %s1004_s29, %s958_s27 }
  0x16   : > { %s960_s4 = sshll.u32 (%p43_p3), %s152_s30, 2 }
  0x17   : > { %s1284_s7 = scalar_lea.vmem (%p43_p3), %s1421_s0, %s960_s4 }
  0x18   : > { %v170_v0 = vld [vmem:[%s1284_s7] sm:$0xff] (%p43_p3)   ;;  %v174_v1 = vld [vmem:[%s1284_s7 + $0x8] sm:$0xff] (%p43_p3)   ;;  %v178_v2 = vld [vmem:[%s1284_s7 + $0x10] sm:$0xff] (%p43_p3)  }
  0x19   : > { %171 = vst [vmem:[%s148_s8] sm:$0xff] %v170_v0   ;;  %175 = vst [vmem:[%s148_s8 + $0x8] sm:$0xff] %v174_v1   ;;  %v182_v3 = vld [vmem:[%s1284_s7 + $0x18] sm:$0xff]   ;;  %v186_v4 = vld [vmem:[%s1284_s7 + $0x80] sm:$0xff]  }
  0x1a   : > { %179 = vst [vmem:[%s148_s8 + $0x10] sm:$0xff] %v178_v2   ;;  %v190_v5 = vld [vmem:[%s1284_s7 + $0x88] sm:$0xff]   ;;  %183 = vst [vmem:[%s148_s8 + $0x18] sm:$0xff] %v182_v3   ;;  %v194_v6 = vld [vmem:[%s1284_s7 + $0x90] sm:$0xff]  }
  0x1b   : > { %187 = vst [vmem:[%s148_s8 + $0x20] sm:$0xff] %v186_v4   ;;  %191 = vst [vmem:[%s148_s8 + $0x28] sm:$0xff] %v190_v5   ;;  %v198_v7 = vld [vmem:[%s1284_s7 + $0x98] sm:$0xff]   ;;  %v202_v8 = vld [vmem:[%s1284_s7 + $0x100] sm:$0xff]  }
  0x1c   : > { %195 = vst [vmem:[%s148_s8 + $0x30] sm:$0xff] %v194_v6   ;;  %199 = vst [vmem:[%s148_s8 + $0x38] sm:$0xff] %v198_v7   ;;  %v206_v9 = vld [vmem:[%s1284_s7 + $0x108] sm:$0xff]   ;;  %v210_v10 = vld [vmem:[%s1284_s7 + $0x110] sm:$0xff]  }
  0x1d   : > { %203 = vst [vmem:[%s148_s8 + $0x40] sm:$0xff] %v202_v8   ;;  %v214_v11 = vld [vmem:[%s1284_s7 + $0x118] sm:$0xff]   ;;  %207 = vst [vmem:[%s148_s8 + $0x48] sm:$0xff] %v206_v9   ;;  %v218_v12 = vld [vmem:[%s1284_s7 + $0x180] sm:$0xff]  }
  0x1e   : > { %211 = vst [vmem:[%s148_s8 + $0x50] sm:$0xff] %v210_v10   ;;  %215 = vst [vmem:[%s148_s8 + $0x58] sm:$0xff] %v214_v11   ;;  %v222_v13 = vld [vmem:[%s1284_s7 + $0x188] sm:$0xff]   ;;  %v226_v14 = vld [vmem:[%s1284_s7 + $0x190] sm:$0xff]  }
  0x1f   : > { %219 = vst [vmem:[%s148_s8 + $0x60] sm:$0xff] %v218_v12   ;;  %223 = vst [vmem:[%s148_s8 + $0x68] sm:$0xff] %v222_v13   ;;  %v230_v15 = vld [vmem:[%s1284_s7 + $0x198] sm:$0xff]  }
  0x20   : > { %227 = vst [vmem:[%s148_s8 + $0x70] sm:$0xff] %v226_v14   ;;  %231 = vst [vmem:[%s148_s8 + $0x78] sm:$0xff] %v230_v15  }
  0x21 PF: > { %p961_p7 = scmp.ge.s32.totalorder %s1201_s18, 1  ;;  %p319_p8 = scmp.lt.s32.totalorder %s1201_s18, 9 }
  0x23   : > { %p320_p9 = pnand %p961_p7, %p319_p8 }
  0x24   : > { %s326_s9 = sand.u32 (!%p320_p9), 1, %s1177_s12   ;;  %p350_p10 = scmp.lt.s32.totalorder (!%p320_p9), %s1189_s15, 1 }
  0x25   : > { %323 = sbr.rel (%p320_p9) target bundleno = 343 (0x157), region = 69  ;;  %s962_s10 = sshll.u32 (!%p320_p9), %s326_s9, 7 }
  0x26   : > { %s1312_s24 = scalar_lea.vmem (!%p320_p9), [#allocation2], %s962_s10  ;;  %p964_p11 = scmp.ne.s32.totalorder (!%p320_p9), %s1185_s14, 0 }
  0x2c   : > { %s1438_s15 = smov (!%p350_p10, %s1189_s15), 1  ;;  %358 = sbr.rel (%p964_p11) target bundleno = 51 (0x33), region = 77 }
  0x2d   : > { %s963_s11 = sshll.u32 %s1438_s15, 2  ;;  %v1203_v16 = vmov (!%p964_p11), 0.0  }
  0x2e   : > { %s1310_s23 = scalar_lea.vmem %s1424_s3, %s963_s11 }
  0x2f   : > { %359 = vst [vmem:[%s1310_s23] sm:$0xf] (!%p964_p11), %v1203_v16 }
  0x33 PF: > { %v1128_v17 = vld [vmem:[%s1422_s1] sm:$0xff]   ;;  %v1129_v18 = vld [vmem:[%s1422_s1 + $0x8] sm:$0xff]   ;;  %v1130_v19 = vld [vmem:[%s1422_s1 + $0x10] sm:$0xff]   ;;  %vm447_vm0 = vcmask 392192   ;;  %vm863_vm1 = vcmask 1041409   ;;  %vm865_vm2 = vcmask 1042434  }
  0x34   : > { %1027 = vmatprep.subr.bf16.mxu0 %v1128_v17  ;;  %1049 = vmatprep.subr.bf16.mxu1 %v1128_v17  ;;  %v1131_v20 = vld [vmem:[%s1312_s24] sm:$0xff]   ;;  %v1132_v21 = vld [vmem:[%s1312_s24 + $0x10] sm:$0xff]   ;;  %v1133_v22 = vld [vmem:[%s1312_s24 + $0x8] sm:$0xff]   ;;  %vm867_vm3 = vcmask 1043459   ;;  %p1001_p12 = scmp.ne.s32.totalorder %s1185_s14, 3 }
  0x35   : > { %1028 = vmatpush3.bf16.msra.mxu0 %v1128_v17  ;;  %1050 = vmatpush3.bf16.msra.mxu1 %v1128_v17  ;;  %v1134_v23 = vld [vmem:[%s1312_s24 + $0x18] sm:$0xff]   ;;  %v1135_v24 = vld [vmem:[%s1312_s24 + $0x20] sm:$0xff]   ;;  %v1136_v25 = vld [vmem:[%s1312_s24 + $0x30] sm:$0xff]  }
  0x36   : > { %1029 = vmatprep.subr.bf16.mxu0 %v1129_v18  ;;  %1051 = vmatprep.subr.bf16.mxu1 %v1129_v18  ;;  %v1137_v26 = vld [vmem:[%s1312_s24 + $0x28] sm:$0xff]   ;;  %v1138_v27 = vld [vmem:[%s1312_s24 + $0x38] sm:$0xff]   ;;  %v1139_v28 = vld [vmem:[%s1312_s24 + $0x40] sm:$0xff]  }
  0x37   : > { %1033 = vmatprep.mubr.msk.bf16.mxu0 %vm447_vm0, %v1131_v20  ;;  %1055 = vmatprep.mubr.msk.bf16.mxu1 %vm447_vm0, %v1132_v21  ;;  %v1140_v29 = vld [vmem:[%s1312_s24 + $0x50] sm:$0xff]   ;;  %v1141_v30 = vld [vmem:[%s1312_s24 + $0x48] sm:$0xff]   ;;  %v1142_v31 = vld [vmem:[%s1312_s24 + $0x58] sm:$0xff]  }
  0x38   : > { %v1143_v32 = vld [vmem:[%s1312_s24 + $0x60] sm:$0xff]   ;;  %v1144_v33 = vld [vmem:[%s1312_s24 + $0x70] sm:$0xff]   ;;  %v1145_v34 = vld [vmem:[%s1312_s24 + $0x68] sm:$0xff]  }
  0x39   : > { %1030 = vmatpush3.bf16.msra.mxu0 %v1129_v18  ;;  %1052 = vmatpush3.bf16.msra.mxu1 %v1129_v18  ;;  %v1146_v35 = vld [vmem:[%s1312_s24 + $0x78] sm:$0xff]   ;;  %v1360_v36 = vld [vmem:[%s1423_s2] ss:$0 sm:$0xff] }
  0x3a   : > { %1031 = vmatprep.subr.bf16.mxu0 %v1130_v19  ;;  %1053 = vmatprep.subr.bf16.mxu1 %v1130_v19 }
  0x3d   : > { %1032 = vmatpush3.bf16.msra.mxu0 %v1130_v19  ;;  %1054 = vmatpush3.bf16.msra.mxu1 %v1130_v19 }
  0x40   : > { %1034 = vmatmul.mubr.msk.bf16.vlgmr.msra.gmra.mrb[0].mxu0 %vm447_vm0, %v1133_v22  ;;  %1056 = vmatmul.mubr.msk.bf16.vlgmr.msra.gmra.mrb[0].mxu1 %vm447_vm0, %v1134_v23 }
  0x41   : > { %1037 = vmatprep.mubr.msk.bf16.mxu0 %vm447_vm0, %v1135_v24  ;;  %1059 = vmatprep.mubr.msk.bf16.mxu1 %vm447_vm0, %v1136_v25 }
  0x48   : > { %1038 = vmatmul.mubr.msk.bf16.gmra.mrb[4].mxu0 %vm447_vm0, %v1137_v26  ;;  %1060 = vmatmul.mubr.msk.bf16.gmra.mrb[4].mxu1 %vm447_vm0, %v1138_v27 }
  0x49   : > { %1041 = vmatprep.mubr.msk.bf16.mxu0 %vm447_vm0, %v1139_v28  ;;  %1063 = vmatprep.mubr.msk.bf16.mxu1 %vm447_vm0, %v1140_v29 }
  0x50   : > { %1042 = vmatmul.mubr.msk.bf16.gmra.mrb[8].mxu0 %vm447_vm0, %v1141_v30  ;;  %1064 = vmatmul.mubr.msk.bf16.gmra.mrb[8].mxu1 %vm447_vm0, %v1142_v31 }
  0x51   : > { %1045 = vmatprep.mubr.msk.bf16.mxu0 %vm447_vm0, %v1143_v32  ;;  %1067 = vmatprep.mubr.msk.bf16.mxu1 %vm447_vm0, %v1144_v33 }
  0x58   : > { %1046 = vmatmul.mubr.msk.bf16.gmra.mrb[12].mxu0 %vm447_vm0, %v1145_v34  ;;  %1068 = vmatmul.mubr.msk.bf16.gmra.mrb[12].mxu1 %vm447_vm0, %v1146_v35 }
 0x113   : > { %v1035_v37 = vpop.f32.mrb[0].mxu0  ;;  %v1057_v38 = vpop.f32.mrb[0].mxu1 }
 0x114   : > { %v506_v39 = vpop.f32.mrb[1].mxu0  ;;  %v739_v40 = vpop.f32.mrb[1].mxu1  ;;  %v515_v47 = vadd.f32 %v1035_v37, %v1360_v36  ;;  %v748_v48 = vadd.f32 %v1057_v38, %v1360_v36 }
 0x115   : > { %v507_v41 = vadd.f32 %v1360_v36, %v506_v39  ;;  %v740_v42 = vadd.f32 %v1360_v36, %v739_v40  ;;  %v1036_v43 = vpop.f32.mrb[2].mxu0  ;;  %v1058_v44 = vpop.f32.mrb[2].mxu1 }
 0x116   : > { %v509_v45 = vpop.f32.mrb[3].mxu0  ;;  %v742_v46 = vpop.f32.mrb[3].mxu1  ;;  %v518_v51 = vadd.f32 %v1036_v43, %v1360_v36  ;;  %v751_v52 = vadd.f32 %v1058_v44, %v1360_v36  ;;  %v571_v57 = vmax.f32 %v515_v47, 0.0  ;;  %v804_v58 = vmax.f32 %v748_v48, 0.0 }
 0x117   : > { %v510_v49 = vadd.f32 %v1360_v36, %v509_v45  ;;  %v743_v50 = vadd.f32 %v1360_v36, %v742_v46  ;;  %v569_v53 = vmax.f32 %v507_v41, 0.0  ;;  %v802_v54 = vmax.f32 %v740_v42, 0.0 }
 0x118   : > { %v572_v1 = vmax.f32 %v518_v51, 0.0  ;;  %v805_v2 = vmax.f32 %v751_v52, 0.0 }
 0x119   : > { %v570_v55 = vmax.f32 %v510_v49, 0.0  ;;  %v803_v56 = vmax.f32 %v743_v50, 0.0 }
 0x11b   : > { %v585_v59 = vadd.f32 %v570_v55, %v569_v53  ;;  %v818_v60 = vadd.f32 %v803_v56, %v802_v54  ;;  %v1039_v61 = vpop.f32.mrb[4].mxu0  ;;  %v1061_v62 = vpop.f32.mrb[4].mxu1 }
 0x11c   : > { %v522_v63 = vpop.f32.mrb[5].mxu0  ;;  %v755_v0 = vpop.f32.mrb[5].mxu1  ;;  %v531_v13 = vadd.f32 %v1039_v61, %v1360_v36  ;;  %v764_v14 = vadd.f32 %v1061_v62, %v1360_v36 }
 0x11d   : > { %v586_v3 = vadd.f32 %v585_v59, %v571_v57  ;;  %v819_v4 = vadd.f32 %v818_v60, %v804_v58  ;;  %v1040_v5 = vpop.f32.mrb[6].mxu0  ;;  %v1062_v6 = vpop.f32.mrb[6].mxu1  ;;  %v523_v7 = vadd.f32 %v1360_v36, %v522_v63  ;;  %v756_v8 = vadd.f32 %v1360_v36, %v755_v0 }
 0x11e   : > { %v525_v9 = vpop.f32.mrb[7].mxu0  ;;  %v758_v10 = vpop.f32.mrb[7].mxu1  ;;  %v534_v19 = vadd.f32 %v1040_v5, %v1360_v36  ;;  %v767_v20 = vadd.f32 %v1062_v6, %v1360_v36  ;;  %v575_v29 = vmax.f32 %v531_v13, 0.0  ;;  %v808_v30 = vmax.f32 %v764_v14, 0.0 }
 0x11f   : > { %v587_v11 = vadd.f32 %v586_v3, %v572_v1  ;;  %v820_v12 = vadd.f32 %v819_v4, %v805_v2  ;;  %v526_v15 = vadd.f32 %v1360_v36, %v525_v9  ;;  %v759_v16 = vadd.f32 %v1360_v36, %v758_v10 }
 0x120   : > { %v573_v21 = vmax.f32 %v523_v7, 0.0  ;;  %v806_v22 = vmax.f32 %v756_v8, 0.0  ;;  %v576_v42 = vmax.f32 %v534_v19, 0.0  ;;  %v809_v43 = vmax.f32 %v767_v20, 0.0 }
 0x121   : > { %v588_v17 = vrot.slane %v587_v11, 4  ;;  %v821_v18 = vrot.slane %v820_v12, 4  ;;  %v574_v23 = vmax.f32 %v526_v15, 0.0  ;;  %v807_v24 = vmax.f32 %v759_v16, 0.0 }
 0x123   : > { %v589_v25 = vadd.f32 %v588_v17, %v587_v11  ;;  %v822_v26 = vadd.f32 %v821_v18, %v820_v12  ;;  %v1043_v27 = vpop.f32.mrb[8].mxu0  ;;  %v1065_v28 = vpop.f32.mrb[8].mxu1  ;;  %v594_v31 = vadd.f32 %v574_v23, %v573_v21  ;;  %v827_v32 = vadd.f32 %v807_v24, %v806_v22 }
 0x124   : > { %v538_v33 = vpop.f32.mrb[9].mxu0  ;;  %v771_v34 = vpop.f32.mrb[9].mxu1  ;;  %v547_v50 = vadd.f32 %v1043_v27, %v1360_v36  ;;  %v780_v51 = vadd.f32 %v1065_v28, %v1360_v36 }
 0x125   : > { %v590_v35 = vrot.slane %v589_v25, 2  ;;  %v823_v37 = vrot.slane %v822_v26, 2  ;;  %v539_v38 = vadd.f32 %v1360_v36, %v538_v33  ;;  %v772_v39 = vadd.f32 %v1360_v36, %v771_v34  ;;  %v1044_v40 = vpop.f32.mrb[10].mxu0  ;;  %v1066_v41 = vpop.f32.mrb[10].mxu1 }
 0x126   : > { %v595_v44 = vadd.f32 %v594_v31, %v575_v29  ;;  %v828_v45 = vadd.f32 %v827_v32, %v808_v30  ;;  %v541_v46 = vpop.f32.mrb[11].mxu0  ;;  %v774_v47 = vpop.f32.mrb[11].mxu1  ;;  %v550_v62 = vadd.f32 %v1044_v40, %v1360_v36  ;;  %v783_v63 = vadd.f32 %v1066_v41, %v1360_v36 }
 0x127   : > { %v591_v48 = vadd.f32 %v590_v35, %v589_v25  ;;  %v824_v49 = vadd.f32 %v823_v37, %v822_v26  ;;  %v577_v54 = vmax.f32 %v539_v38, 0.0  ;;  %v810_v55 = vmax.f32 %v772_v39, 0.0 }
 0x128   : > { %v596_v52 = vadd.f32 %v595_v44, %v576_v42  ;;  %v829_v53 = vadd.f32 %v828_v45, %v809_v43  ;;  %v542_v58 = vadd.f32 %v1360_v36, %v541_v46  ;;  %v775_v59 = vadd.f32 %v1360_v36, %v774_v47 }
 0x129   : > { %v592_v56 = vrot.slane %v591_v48, 1  ;;  %v825_v57 = vrot.slane %v824_v49, 1  ;;  %v579_v8 = vmax.f32 %v547_v50, 0.0  ;;  %v812_v9 = vmax.f32 %v780_v51, 0.0 }
 0x12a   : > { %v597_v60 = vrot.slane %v596_v52, 4  ;;  %v830_v61 = vrot.slane %v829_v53, 4  ;;  %v578_v2 = vmax.f32 %v542_v58, 0.0  ;;  %v811_v3 = vmax.f32 %v775_v59, 0.0 }
 0x12b   : > { %v593_v0 = vadd.f32 %v592_v56, %v591_v48  ;;  %v826_v1 = vadd.f32 %v825_v57, %v824_v49  ;;  %v1047_v4 = vpop.f32.mrb[12].mxu0  ;;  %v1069_v5 = vpop.f32.mrb[12].mxu1  ;;  %v580_v23 = vmax.f32 %v550_v62, 0.0  ;;  %v813_v24 = vmax.f32 %v783_v63, 0.0 }
 0x12c   : > { %v598_v6 = vadd.f32 %v597_v60, %v596_v52  ;;  %v831_v7 = vadd.f32 %v830_v61, %v829_v53  ;;  %v554_v10 = vpop.f32.mrb[13].mxu0  ;;  %v787_v11 = vpop.f32.mrb[13].mxu1  ;;  %v603_v13 = vadd.f32 %v578_v2, %v577_v54  ;;  %v836_v14 = vadd.f32 %v811_v3, %v810_v55 }
 0x12d   : > { %v854_v12 = vadd.f32 %v826_v1, %v593_v0  ;;  %v563_v15 = vadd.f32 %v1047_v4, %v1360_v36  ;;  %v1048_v16 = vpop.f32.mrb[14].mxu0  ;;  %v1070_v17 = vpop.f32.mrb[14].mxu1  ;;  %v555_v20 = vadd.f32 %v1360_v36, %v554_v10  ;;  %v796_v29 = vadd.f32 %v1069_v5, %v1360_v36 }
 0x12e   : > { %v599_v18 = vrot.slane %v598_v6, 2  ;;  %v832_v19 = vrot.slane %v831_v7, 2  ;;  %v557_v21 = vpop.f32.mrb[15].mxu0  ;;  %v790_v22 = vpop.f32.mrb[15].mxu1  ;;  %v604_v25 = vadd.f32 %v603_v13, %v579_v8  ;;  %v837_v26 = vadd.f32 %v836_v14, %v812_v9 }
 0x12f   : > { %v788_v30 = vadd.f32 %v1360_v36, %v787_v11  ;;  %v583_v33 = vmax.f32 %v563_v15, 0.0  ;;  %v558_v34 = vadd.f32 %v1360_v36, %v557_v21  ;;  %v581_v38 = vmax.f32 %v555_v20, 0.0  ;;  %v858_v20 = vld [vmem:[%s1310_s23] sm:$0xf] }
 0x130   : > { %v600_v27 = vadd.f32 %v599_v18, %v598_v6  ;;  %v833_v28 = vadd.f32 %v832_v19, %v831_v7  ;;  %v605_v31 = vadd.f32 %v604_v25, %v580_v23  ;;  %v838_v32 = vadd.f32 %v837_v26, %v813_v24 }
 0x131   : > { %v566_v39 = vadd.f32 %v1048_v16, %v1360_v36  ;;  %v582_v42 = vmax.f32 %v558_v34, 0.0  ;;  %v791_v43 = vadd.f32 %v1360_v36, %v790_v22  ;;  %v814_v46 = vmax.f32 %v788_v30, 0.0 }
 0x132   : > { %v601_v35 = vrot.slane %v600_v27, 1  ;;  %v834_v37 = vrot.slane %v833_v28, 1  ;;  %v606_v40 = vrot.slane %v605_v31, 4  ;;  %v839_v41 = vrot.slane %v838_v32, 4 }
 0x133   : > { %v799_v47 = vadd.f32 %v1070_v17, %v1360_v36  ;;  %v612_v50 = vadd.f32 %v582_v42, %v581_v38  ;;  %v815_v51 = vmax.f32 %v791_v43, 0.0  ;;  %v816_v53 = vmax.f32 %v796_v29, 0.0 }
 0x134   : > { %v602_v44 = vadd.f32 %v601_v35, %v600_v27  ;;  %v835_v45 = vadd.f32 %v834_v37, %v833_v28  ;;  %v607_v48 = vadd.f32 %v606_v40, %v605_v31  ;;  %v840_v49 = vadd.f32 %v839_v41, %v838_v32 }
 0x135   : > { %v584_v54 = vmax.f32 %v566_v39, 0.0  ;;  %v613_v57 = vadd.f32 %v612_v50, %v583_v33  ;;  %v845_v58 = vadd.f32 %v815_v51, %v814_v46  ;;  %v817_v60 = vmax.f32 %v799_v47, 0.0 }
 0x136   : > { %v855_v52 = vadd.f32 %v835_v45, %v602_v44  ;;  %v608_v55 = vrot.slane %v607_v48, 2  ;;  %v841_v56 = vrot.slane %v840_v49, 2 }
 0x137   : > { %v614_v63 = vadd.f32 %v613_v57, %v584_v54  ;;  %v846_v0 = vadd.f32 %v845_v58, %v816_v53 }
 0x138   : > { %v864_v59 = vsel %vm863_vm1, %v855_v52, %v854_v12  ;;  %v609_v61 = vadd.f32 %v608_v55, %v607_v48  ;;  %v842_v62 = vadd.f32 %v841_v56, %v840_v49 }
 0x139   : > { %v615_v2 = vrot.slane %v614_v63, 4  ;;  %v847_v3 = vadd.f32 %v846_v0, %v817_v60 }
 0x13a   : > { %v610_v1 = vrot.slane %v609_v61, 1  ;;  %v843_v36 = vrot.slane %v842_v62, 1 }
 0x13b   : > { %v616_v6 = vadd.f32 %v615_v2, %v614_v63  ;;  %v848_v7 = vrot.slane %v847_v3, 4 }
 0x13c   : > { %v611_v4 = vadd.f32 %v610_v1, %v609_v61  ;;  %v844_v5 = vadd.f32 %v843_v36, %v842_v62 }
 0x13d   : > { %v617_v9 = vrot.slane %v616_v6, 2  ;;  %v849_v10 = vadd.f32 %v848_v7, %v847_v3 }
 0x13e   : > { %v856_v8 = vadd.f32 %v844_v5, %v611_v4 }
 0x13f   : > { %v618_v12 = vadd.f32 %v617_v9, %v616_v6  ;;  %v850_v13 = vrot.slane %v849_v10, 2 }
 0x140   : > { %v866_v11 = vsel %vm865_vm2, %v856_v8, %v864_v59 }
 0x141   : > { %v619_v14 = vrot.slane %v618_v12, 1  ;;  %v851_v15 = vadd.f32 %v850_v13, %v849_v10 }
 0x143   : > { %v620_v16 = vadd.f32 %v619_v14, %v618_v12  ;;  %v852_v17 = vrot.slane %v851_v15, 1 }
 0x145   : > { %v853_v18 = vadd.f32 %v852_v17, %v851_v15 }
 0x146   : > { %875 = sbr.rel (%p1001_p12) target bundleno = 343 (0x157), region = 81 }
 0x147   : > { %v857_v19 = vadd.f32 %v853_v18, %v620_v16 }
 0x149   : > { %v868_v21 = vsel %vm867_vm3, %v857_v19, %v866_v11 }
 0x14a   : > { %v870_v22 = vadd.f32 %v868_v21, %v858_v20 }
 0x14c   : > { %871 = vst [vmem:[%s1310_s23] sm:$0xf] %v870_v22 }
 0x153   : > { %v876_v23 = vld [vmem:[%s1310_s23] sm:$0xf] }
 0x154   : > { %v877_v24 = vmul.f32 0.00390625, %v876_v23 }
 0x156   : > { %878 = vst [vmem:[%s1310_s23] sm:$0xf] %v877_v24 }
 0x157 PF: > { %s13_s18 = sadd.s32 1, %s1201_s18   ;;  %s1425_s12 = smov %s1181_s13 }
 0x158   : > { %p10_p13 = scmp.ge.s32.totalorder %s13_s18, 10   ;;  %s1426_s13 = smov %s1275_s25 }
 0x159   : > { %s1427_s14 = smov %s1193_s16  ;;  %s1428_s15 = smov %s1197_s17 }
 0x15a   : > { %s1429_s16 = smov %s1432_s19  ;;  %s1430_s17 = smov %s1436_s20 }
 0x15b   :  { %12 = sbr.rel (!%p10_p13) target bundleno = 4 (0x4), region = 116 }

// kernel: baseline_graphconv_forward.4
= control target key start
LH: loop header
LB: loop body
LE: loop exit
PB: predicated region body
PF: predicated region fallthrough
CT: control target
= control target key end

     0   :  { %v534_v0 = vmov 0.0   ;;  %vm535_vm0 = vmmov 0   ;;  %v60_v3 = vlaneseq  ;;  %vm66_vm2 = vcmask 64512   ;;  %s678_s0 = inlined_call_operand.vmem [shape: f32[8,128], index: 0, kind: input, shape index: {}]   ;;  %s679_s1 = inlined_call_operand.vmem [shape: bf16[128,128], index: 1, kind: input, shape index: {}]   ;;  %s680_s2 = inlined_call_operand.vmem [shape: bf16[128,128], index: 2, kind: input, shape index: {}]   ;;  %s681_s3 = inlined_call_operand.vmem [shape: f32[1,128], index: 3, kind: input, shape index: {}]   ;;  %s682_s4 = inlined_call_operand.vmem [shape: f32[8,128], index: 4, kind: output, shape index: {}]  }
   0x1   :  { %464 = vmatprep.subr.bf16.mxu0 %v534_v0  ;;  %v18_v1 = vld [vmem:[%s678_s0] sm:$0xff]  ;;  %466 = vmatprep.mubr.msk.bf16.mxu0 %vm535_vm0, %v534_v0  ;;  %vm188_vm11 = vcmask 1043456  }
   0x2   :  { %v567_v2 = vpack.c.bf16 %v18_v1, %v18_v1  ;;  %470 = vmatprep.subr.bf16.mxu1 %v534_v0  ;;  %472 = vmatprep.mubr.msk.bf16.mxu1 %vm535_vm0, %v534_v0  ;;  %v61_v4 = vshrl.u32 %v60_v3, 7  ;;  %v577_v5 = vand.u32 127, %v60_v3 }
   0x4   :  { %465 = vmatpush3.bf16.xpose.msra.mxu0 %v567_v2  ;;  %vm64_vm1 = vcmp.eq.s32.totalorder %v61_v4, %v577_v5  ;;  %v190_v4 = vsel %vm188_vm11, %v567_v2, 0 }
   0x5   :  { %496 = vmatprep.subr.bf16.mxu0 %v534_v0  ;;  %471 = vmatpush3.bf16.msra.mxu1 %v190_v4 }
   0x6   :  { %476 = vmatprep.subr.bf16.mxu1 %v534_v0 }
   0xb   :  { %467 = vmatmul.mubr.bf16.vlgmr.msra.gmra.mrb[0].mxu0 %v567_v2 }
   0xc   :  { %512 = vmatprep.mubr.msk.bf16.mxu0 %vm535_vm0, %v534_v0 }
  0xde   :  { %v54_v6 = vpop.f32.mrb[0].mxu0 }
  0xdf   :  { %v65_v7 = vsel %vm64_vm1, %v54_v6, 0.0  ;;  %v468_v8 = vpop.f32.mrb[1].mxu0  ;;  %v74_v18 = vmul.f32 2.0, %v54_v6  ;;  %v518_v6 = vld [vmem:[%s679_s1] sm:$0xff]  }
  0xe0   :  { %v67_v9 = vsel %vm66_vm2, %v65_v7, 0.0  ;;  %v57_v10 = vpop.f32.mrb[2].mxu0  ;;  %497 = vmatpush3.bf16.msra.mxu0 %v518_v6  ;;  %v520_v7 = vld [vmem:[%s679_s1 + $0x8] sm:$0xff]   ;;  %v522_v8 = vld [vmem:[%s679_s1 + $0x10] sm:$0xff]  }
  0xe1   :  { %v68_v11 = vrot.slane %v67_v9, 4  ;;  %v469_v12 = vpop.f32.mrb[3].mxu0  ;;  %498 = vmatprep.subr.bf16.mxu0 %v534_v0  ;;  %v526_v10 = vld [vmem:[%s679_s1 + $0x20] sm:$0xff]  }
  0xe2   :  { %v530_v12 = vld [vmem:[%s679_s1 + $0x30] sm:$0xff]  }
  0xe3   :  { %v69_v13 = vadd.f32 %v68_v11, %v67_v9  ;;  %v524_v9 = vld [vmem:[%s679_s1 + $0x18] sm:$0xff]   ;;  %v528_v11 = vld [vmem:[%s679_s1 + $0x28] sm:$0xff]  }
  0xe4   :  { %499 = vmatpush3.bf16.msra.mxu0 %v520_v7 }
  0xe5   :  { %v70_v14 = vrot.slane %v69_v13, 2  ;;  %500 = vmatprep.subr.bf16.mxu0 %v534_v0 }
  0xe7   :  { %v71_v15 = vadd.f32 %v70_v14, %v69_v13  ;;  %v532_v13 = vld [vmem:[%s679_s1 + $0x38] sm:$0xff]  }
  0xe8   :  { %501 = vmatpush3.bf16.msra.mxu0 %v522_v8 }
  0xe9   :  { %v72_v16 = vrot.slane %v71_v15, 1  ;;  %502 = vmatprep.subr.bf16.mxu0 %v534_v0 }
  0xeb   :  { %v73_v17 = vadd.f32 %v72_v16, %v71_v15 }
  0xec   :  { %503 = vmatpush3.bf16.msra.mxu0 %v524_v9 }
  0xed   :  { %v75_v19 = vsub.f32 %v73_v17, %v74_v18  ;;  %504 = vmatprep.subr.bf16.mxu0 %v534_v0 }
  0xef   :  { %v76_v20 = vsel %vm64_vm1, 1e+30, %v75_v19 }
  0xf0   :  { %v77_v21 = vsel %vm66_vm2, %v76_v20, inf  ;;  %505 = vmatpush3.bf16.msra.mxu0 %v526_v10 }
  0xf1   :  { %78 = vmin.xlane.f32.xlu0 %v77_v21  ;;  %506 = vmatprep.subr.bf16.mxu0 %v534_v0  ;;  %v519_v21 = vld [vmem:[%s680_s2] sm:$0xff]  }
  0xf4   :  { %507 = vmatpush3.bf16.msra.mxu0 %v528_v11 }
  0xf5   :  { %508 = vmatprep.subr.bf16.mxu0 %v534_v0 }
  0xf8   :  { %509 = vmatpush3.bf16.msra.mxu0 %v530_v12 }
  0xf9   :  { %510 = vmatprep.subr.bf16.mxu0 %v534_v0 }
  0xfc   :  { %511 = vmatpush3.bf16.msra.mxu0 %v532_v13 }
  0xff   :  { %513 = vmatmul.mubr.bf16.vlgmr.msra.gmra.mrb[4].mxu0 %v567_v2  ;;  %v521_v2 = vld [vmem:[%s680_s2 + $0x8] sm:$0xff]  }
 0x17e   :  { %v79_v22 = vpop.xlane.xlu0 %78 }
 0x17f   :  { %vm80_vm3 = vcmp.eq.f32.partialorder %v76_v20, %v79_v22 }
 0x180   :  { %v81_v23 = vsel %vm80_vm3, %v577_v5, 8 }
 0x181   :  { %v82_v24 = vsel %vm66_vm2, %v81_v23, 2147483647  ;;  %v525_v23 = vld [vmem:[%s680_s2 + $0x18] sm:$0xff]  }
 0x182   :  { %v84_v25 = vshra.s32 %v82_v24, 16  ;;  %v83_v27 = vand.u32 65535, %v82_v24  ;;  %v527_v24 = vld [vmem:[%s680_s2 + $0x20] sm:$0xff]  }
 0x184   :  { %v86_v26 = vcvt.s32.f32 %v84_v25  ;;  %v85_v29 = vcvt.s32.f32 %v83_v27  ;;  %v529_v25 = vld [vmem:[%s680_s2 + $0x28] sm:$0xff]   ;;  %v533_v27 = vld [vmem:[%s680_s2 + $0x38] sm:$0xff]  }
 0x186   :  { %87 = vmin.xlane.f32.xlu0 %v86_v26 }
 0x213   :  { %v88_v28 = vpop.xlane.xlu0 %87 }
 0x214   :  { %vm89_vm4 = vcmp.eq.f32.partialorder %v86_v26, %v88_v28  ;;  %v94_v31 = vcvt.f32.s32 %v88_v28  ;;  %v531_v26 = vld [vmem:[%s680_s2 + $0x30] sm:$0xff]   ;;  %v403_v28 = vpop.f32.mrb[4].mxu0 }
 0x215   :  { %v90_v30 = vsel %vm89_vm4, %v85_v29, inf  ;;  %v514_v29 = vpop.f32.mrb[5].mxu0 }
 0x216   :  { %91 = vmin.xlane.f32.xlu1 %v90_v30  ;;  %v95_v33 = vshll.u32 %v94_v31, 16  ;;  %v406_v30 = vpop.f32.mrb[6].mxu0 }
 0x217   :  { %v515_v31 = vpop.f32.mrb[7].mxu0 }
 0x2a3   :  { %v92_v32 = vpop.xlane.xlu1 %91 }
 0x2a4   :  { %v93_v34 = vcvt.f32.s32 %v92_v32 }
 0x2a6   :  { %v96_v35 = vadd.s32 %v95_v33, %v93_v34 }
 0x2a8   :  { %vm97_vm5 = vcmp.eq.s32.totalorder %v577_v5, %v96_v35 }
 0x2a9   :  { %v101_v36 = vsel %vm97_vm5, 1e+30, %v76_v20  ;;  %v421_v52 = vsel %vm97_vm5, 1.0, %v534_v0 }
 0x2aa   :  { %v102_v37 = vsel %vm66_vm2, %v101_v36, inf }
 0x2ab   :  { %103 = vmin.xlane.f32.xlu1 %v102_v37  ;;  %v441_v37 = vld [vmem:[%s681_s3] ss:$0 sm:$0xff] }
 0x338   :  { %v104_v38 = vpop.xlane.xlu1 %103 }
 0x339   :  { %vm105_vm6 = vcmp.eq.f32.partialorder %v101_v36, %v104_v38 }
 0x33a   :  { %v106_v39 = vsel %vm105_vm6, %v577_v5, 8 }
 0x33b   :  { %v107_v40 = vsel %vm66_vm2, %v106_v39, 2147483647 }
 0x33c   :  { %v109_v41 = vshra.s32 %v107_v40, 16  ;;  %v108_v43 = vand.u32 65535, %v107_v40 }
 0x33e   :  { %v111_v42 = vcvt.s32.f32 %v109_v41  ;;  %v110_v45 = vcvt.s32.f32 %v108_v43 }
 0x340   :  { %112 = vmin.xlane.f32.xlu0 %v111_v42 }
 0x3cd   :  { %v113_v44 = vpop.xlane.xlu0 %112 }
 0x3ce   :  { %vm114_vm7 = vcmp.eq.f32.partialorder %v111_v42, %v113_v44  ;;  %v119_v47 = vcvt.f32.s32 %v113_v44 }
 0x3cf   :  { %v115_v46 = vsel %vm114_vm7, %v110_v45, inf }
 0x3d0   :  { %116 = vmin.xlane.f32.xlu1 %v115_v46  ;;  %v120_v49 = vshll.u32 %v119_v47, 16 }
 0x45d   :  { %v117_v48 = vpop.xlane.xlu1 %116 }
 0x45e   :  { %v118_v50 = vcvt.f32.s32 %v117_v48 }
 0x460   :  { %v121_v51 = vadd.s32 %v120_v49, %v118_v50 }
 0x462   :  { %vm122_vm8 = vcmp.eq.s32.totalorder %v577_v5, %v121_v51 }
 0x463   :  { %v126_v53 = vsel %vm122_vm8, 1e+30, %v101_v36  ;;  %v422_v54 = vsel %vm122_vm8, 1.0, %v534_v0 }
 0x464   :  { %v127_v55 = vsel %vm66_vm2, %v126_v53, inf  ;;  %v125_v56 = vadd.f32 %v422_v54, %v421_v52 }
 0x465   :  { %128 = vmin.xlane.f32.xlu0 %v127_v55 }
 0x4f2   :  { %v129_v57 = vpop.xlane.xlu0 %128 }
 0x4f3   :  { %vm130_vm9 = vcmp.eq.f32.partialorder %v126_v53, %v129_v57 }
 0x4f4   :  { %v131_v58 = vsel %vm130_vm9, %v577_v5, 8 }
 0x4f5   :  { %v132_v59 = vsel %vm66_vm2, %v131_v58, 2147483647 }
 0x4f6   :  { %v134_v60 = vshra.s32 %v132_v59, 16  ;;  %v133_v62 = vand.u32 65535, %v132_v59 }
 0x4f8   :  { %v136_v61 = vcvt.s32.f32 %v134_v60  ;;  %v135_v1 = vcvt.s32.f32 %v133_v62 }
 0x4fa   :  { %137 = vmin.xlane.f32.xlu1 %v136_v61 }
 0x587   :  { %v138_v63 = vpop.xlane.xlu1 %137 }
 0x588   :  { %vm139_vm10 = vcmp.eq.f32.partialorder %v136_v61, %v138_v63  ;;  %v144_v14 = vcvt.f32.s32 %v138_v63 }
 0x589   :  { %v140_v3 = vsel %vm139_vm10, %v135_v1, inf }
 0x58a   :  { %141 = vmin.xlane.f32.xlu0 %v140_v3  ;;  %v145_v16 = vshll.u32 %v144_v14, 16 }
 0x617   :  { %v142_v15 = vpop.xlane.xlu0 %141 }
 0x618   :  { %v143_v17 = vcvt.f32.s32 %v142_v15 }
 0x61a   :  { %v146_v18 = vadd.s32 %v145_v16, %v143_v17 }
 0x61c   :  { %vm147_vm12 = vcmp.eq.s32.totalorder %v577_v5, %v146_v18  ;;  %v523_v5 = vld [vmem:[%s680_s2 + $0x10] sm:$0xff]  }
 0x61d   :  { %v423_v19 = vsel %vm147_vm12, 1.0, %v534_v0 }
 0x61e   :  { %v150_v20 = vadd.f32 %v423_v19, %v125_v56 }
 0x620   :  { %v151_v22 = vpack.c.bf16 %v150_v20, %v150_v20 }
 0x622   :  { %473 = vmatmul.mubr.msk.bf16.vlgmr.msra.gmra.mrb[0].mxu1 %vm66_vm2, %v151_v22 }
 0x623   :  { %477 = vmatpush3.bf16.msra.mxu1 %v519_v21  ;;  %492 = vmatprep.mubr.msk.bf16.mxu1 %vm535_vm0, %v534_v0 }
 0x624   :  { %478 = vmatprep.subr.bf16.mxu1 %v534_v0 }
 0x627   :  { %479 = vmatpush3.bf16.msra.mxu1 %v521_v2 }
 0x628   :  { %480 = vmatprep.subr.bf16.mxu1 %v534_v0 }
 0x62b   :  { %481 = vmatpush3.bf16.msra.mxu1 %v523_v5 }
 0x62c   :  { %482 = vmatprep.subr.bf16.mxu1 %v534_v0 }
 0x62f   :  { %483 = vmatpush3.bf16.msra.mxu1 %v525_v23 }
 0x630   :  { %484 = vmatprep.subr.bf16.mxu1 %v534_v0 }
 0x633   :  { %485 = vmatpush3.bf16.msra.mxu1 %v527_v24 }
 0x634   :  { %486 = vmatprep.subr.bf16.mxu1 %v534_v0 }
 0x637   :  { %487 = vmatpush3.bf16.msra.mxu1 %v529_v25 }
 0x638   :  { %488 = vmatprep.subr.bf16.mxu1 %v534_v0 }
 0x63b   :  { %489 = vmatpush3.bf16.msra.mxu1 %v531_v26 }
 0x63c   :  { %490 = vmatprep.subr.bf16.mxu1 %v534_v0 }
 0x63f   :  { %491 = vmatpush3.bf16.msra.mxu1 %v533_v27 }
 0x6f5   :  { %v226_v32 = vpop.f32.mrb[0].mxu1 }
 0x6f6   :  { %v232_v33 = vpack.c.bf16 %v226_v32, %v226_v32  ;;  %v474_v34 = vpop.f32.mrb[1].mxu1 }
 0x6f7   :  { %v229_v35 = vpop.f32.mrb[2].mxu1 }
 0x6f8   :  { %v475_v36 = vpop.f32.mrb[3].mxu1  ;;  %493 = vmatmul.mubr.bf16.vlgmr.msra.gmra.mrb[4].mxu1 %v232_v33 }
 0x7cb   :  { %v315_v0 = vpop.f32.mrb[4].mxu1 }
 0x7cc   :  { %v404_v38 = vadd.f32 %v403_v28, %v315_v0  ;;  %v494_v39 = vpop.f32.mrb[5].mxu1 }
 0x7cd   :  { %v318_v40 = vpop.f32.mrb[6].mxu1 }
 0x7ce   :  { %v415_v41 = vadd.f32 %v441_v37, %v404_v38  ;;  %v495_v42 = vpop.f32.mrb[7].mxu1 }
 0x7d0   :  { %416 = vst [vmem:[%s682_s4] sm:$0xff] %v415_v41 }

// kernel: baseline_graphconv_forward.5
= control target key start
LH: loop header
LB: loop body
LE: loop exit
PB: predicated region body
PF: predicated region fallthrough
CT: control target
= control target key end

     0   :  { %v570_v1 = vmov 0.0   ;;  %vm571_vm0 = vmmov 0   ;;  %s724_s0 = inlined_call_operand.vmem [shape: f32[8,128], index: 0, kind: input, shape index: {}]   ;;  %s725_s1 = inlined_call_operand.vmem [shape: bf16[128,128], index: 1, kind: input, shape index: {}]   ;;  %s726_s2 = inlined_call_operand.vmem [shape: bf16[128,128], index: 2, kind: input, shape index: {}]   ;;  %s727_s3 = inlined_call_operand.vmem [shape: f32[1,128], index: 3, kind: input, shape index: {}]   ;;  %s728_s4 = inlined_call_operand.hbm [shape: f32[8,128], index: 4, kind: output, shape index: {}]  }
   0x1   :  { %v19_v0 = vld [vmem:[%s724_s0] sm:$0xff]  ;;  %475 = vmatprep.subr.bf16.mxu0 %v570_v1  ;;  %477 = vmatprep.mubr.msk.bf16.mxu0 %vm571_vm0, %v570_v1 }
   0x2   :  { %v602_v2 = vpack.c.bf16 %v19_v0, %v19_v0  ;;  %481 = vmatprep.subr.bf16.mxu1 %v570_v1  ;;  %483 = vmatprep.mubr.msk.bf16.mxu1 %vm571_vm0, %v570_v1 }
   0x4   :  { %476 = vmatpush3.bf16.xpose.msra.mxu0 %v602_v2 }
   0x5   :  { %507 = vmatprep.subr.bf16.mxu0 %v570_v1 }
   0xb   :  { %478 = vmatmul.mubr.bf16.vlgmr.msra.gmra.mrb[0].mxu0 %v602_v2 }
   0xc   :  { %523 = vmatprep.mubr.msk.bf16.mxu0 %vm571_vm0, %v570_v1 }
   0xd   :  { %9 = vsyncpa [#allocation3], 0  ;;  %v61_v3 = vlaneseq  ;;  %vm67_vm2 = vcmask 64512   ;;  %vm189_vm11 = vcmask 1043456   ;;  %s572_s22 = smov [#allocation2]  }
   0xe   :  { %s424_s23 = sshll.u32 %s572_s22, 4  ;;  %s425_s23 = int_to_ptr.vmem [resolvable:$true] %s424_s23 }
   0xf   :  { %v62_v4 = vshrl.u32 %v61_v3, 7  ;;  %v614_v5 = vand.u32 127, %v61_v3  ;;  %p551_p1 = scmp.lt.s32.totalorder %s425_s23, %s425_s23 }
  0x11   :  { %vm65_vm1 = vcmp.eq.s32.totalorder %v62_v4, %v614_v5  ;;  %v191_v4 = vsel %vm189_vm11, %v602_v2, 0 }
  0x12   :  { %482 = vmatpush3.bf16.msra.mxu1 %v191_v4 }
  0x13   :  { %487 = vmatprep.subr.bf16.mxu1 %v570_v1 }
  0xde   :  { %v55_v6 = vpop.f32.mrb[0].mxu0 }
  0xdf   :  { %v66_v7 = vsel %vm65_vm1, %v55_v6, 0.0  ;;  %v479_v8 = vpop.f32.mrb[1].mxu0  ;;  %v75_v18 = vmul.f32 2.0, %v55_v6  ;;  %v530_v6 = vld [vmem:[%s725_s1] sm:$0xff]  }
  0xe0   :  { %v68_v9 = vsel %vm67_vm2, %v66_v7, 0.0  ;;  %v58_v10 = vpop.f32.mrb[2].mxu0  ;;  %508 = vmatpush3.bf16.msra.mxu0 %v530_v6  ;;  %v532_v7 = vld [vmem:[%s725_s1 + $0x8] sm:$0xff]   ;;  %v534_v8 = vld [vmem:[%s725_s1 + $0x10] sm:$0xff]  }
  0xe1   :  { %v69_v11 = vrot.slane %v68_v9, 4  ;;  %v480_v12 = vpop.f32.mrb[3].mxu0  ;;  %509 = vmatprep.subr.bf16.mxu0 %v570_v1  ;;  %v538_v10 = vld [vmem:[%s725_s1 + $0x20] sm:$0xff]  }
  0xe2   :  { %v542_v12 = vld [vmem:[%s725_s1 + $0x30] sm:$0xff]  }
  0xe3   :  { %v70_v13 = vadd.f32 %v69_v11, %v68_v9  ;;  %v536_v9 = vld [vmem:[%s725_s1 + $0x18] sm:$0xff]   ;;  %v540_v11 = vld [vmem:[%s725_s1 + $0x28] sm:$0xff]  }
  0xe4   :  { %510 = vmatpush3.bf16.msra.mxu0 %v532_v7 }
  0xe5   :  { %v71_v14 = vrot.slane %v70_v13, 2  ;;  %511 = vmatprep.subr.bf16.mxu0 %v570_v1 }
  0xe7   :  { %v72_v15 = vadd.f32 %v71_v14, %v70_v13  ;;  %v544_v13 = vld [vmem:[%s725_s1 + $0x38] sm:$0xff]  }
  0xe8   :  { %512 = vmatpush3.bf16.msra.mxu0 %v534_v8 }
  0xe9   :  { %v73_v16 = vrot.slane %v72_v15, 1  ;;  %513 = vmatprep.subr.bf16.mxu0 %v570_v1 }
  0xeb   :  { %v74_v17 = vadd.f32 %v73_v16, %v72_v15 }
  0xec   :  { %514 = vmatpush3.bf16.msra.mxu0 %v536_v9 }
  0xed   :  { %v76_v19 = vsub.f32 %v74_v17, %v75_v18  ;;  %515 = vmatprep.subr.bf16.mxu0 %v570_v1 }
  0xef   :  { %v77_v20 = vsel %vm65_vm1, 1e+30, %v76_v19 }
  0xf0   :  { %v78_v21 = vsel %vm67_vm2, %v77_v20, inf  ;;  %516 = vmatpush3.bf16.msra.mxu0 %v538_v10 }
  0xf1   :  { %79 = vmin.xlane.f32.xlu0 %v78_v21  ;;  %517 = vmatprep.subr.bf16.mxu0 %v570_v1  ;;  %v531_v21 = vld [vmem:[%s726_s2] sm:$0xff]  }
  0xf4   :  { %518 = vmatpush3.bf16.msra.mxu0 %v540_v11 }
  0xf5   :  { %519 = vmatprep.subr.bf16.mxu0 %v570_v1 }
  0xf8   :  { %520 = vmatpush3.bf16.msra.mxu0 %v542_v12 }
  0xf9   :  { %521 = vmatprep.subr.bf16.mxu0 %v570_v1 }
  0xfc   :  { %522 = vmatpush3.bf16.msra.mxu0 %v544_v13 }
  0xff   :  { %524 = vmatmul.mubr.bf16.vlgmr.msra.gmra.mrb[4].mxu0 %v602_v2  ;;  %v533_v2 = vld [vmem:[%s726_s2 + $0x8] sm:$0xff]  }
 0x17e   :  { %v80_v22 = vpop.xlane.xlu0 %79 }
 0x17f   :  { %vm81_vm3 = vcmp.eq.f32.partialorder %v77_v20, %v80_v22 }
 0x180   :  { %v82_v23 = vsel %vm81_vm3, %v614_v5, 8 }
 0x181   :  { %v83_v24 = vsel %vm67_vm2, %v82_v23, 2147483647  ;;  %v537_v23 = vld [vmem:[%s726_s2 + $0x18] sm:$0xff]  }
 0x182   :  { %v85_v25 = vshra.s32 %v83_v24, 16  ;;  %v84_v27 = vand.u32 65535, %v83_v24  ;;  %v539_v24 = vld [vmem:[%s726_s2 + $0x20] sm:$0xff]  }
 0x184   :  { %v87_v26 = vcvt.s32.f32 %v85_v25  ;;  %v86_v29 = vcvt.s32.f32 %v84_v27  ;;  %v541_v25 = vld [vmem:[%s726_s2 + $0x28] sm:$0xff]   ;;  %v545_v27 = vld [vmem:[%s726_s2 + $0x38] sm:$0xff]  }
 0x186   :  { %88 = vmin.xlane.f32.xlu0 %v87_v26 }
 0x213   :  { %v89_v28 = vpop.xlane.xlu0 %88 }
 0x214   :  { %vm90_vm4 = vcmp.eq.f32.partialorder %v87_v26, %v89_v28  ;;  %v95_v31 = vcvt.f32.s32 %v89_v28  ;;  %v543_v26 = vld [vmem:[%s726_s2 + $0x30] sm:$0xff]   ;;  %v404_v28 = vpop.f32.mrb[4].mxu0 }
 0x215   :  { %v91_v30 = vsel %vm90_vm4, %v86_v29, inf  ;;  %v525_v29 = vpop.f32.mrb[5].mxu0 }
 0x216   :  { %92 = vmin.xlane.f32.xlu1 %v91_v30  ;;  %v96_v33 = vshll.u32 %v95_v31, 16  ;;  %v407_v30 = vpop.f32.mrb[6].mxu0 }
 0x217   :  { %v526_v31 = vpop.f32.mrb[7].mxu0 }
 0x2a3   :  { %v93_v32 = vpop.xlane.xlu1 %92 }
 0x2a4   :  { %v94_v34 = vcvt.f32.s32 %v93_v32 }
 0x2a6   :  { %v97_v35 = vadd.s32 %v96_v33, %v94_v34 }
 0x2a8   :  { %vm98_vm5 = vcmp.eq.s32.totalorder %v614_v5, %v97_v35 }
 0x2a9   :  { %v102_v36 = vsel %vm98_vm5, 1e+30, %v77_v20  ;;  %v432_v52 = vsel %vm98_vm5, 1.0, %v570_v1 }
 0x2aa   :  { %v103_v37 = vsel %vm67_vm2, %v102_v36, inf }
 0x2ab   :  { %104 = vmin.xlane.f32.xlu1 %v103_v37 }
 0x338   :  { %v105_v38 = vpop.xlane.xlu1 %104 }
 0x339   :  { %vm106_vm6 = vcmp.eq.f32.partialorder %v102_v36, %v105_v38 }
 0x33a   :  { %v107_v39 = vsel %vm106_vm6, %v614_v5, 8 }
 0x33b   :  { %v108_v40 = vsel %vm67_vm2, %v107_v39, 2147483647 }
 0x33c   :  { %v110_v41 = vshra.s32 %v108_v40, 16  ;;  %v109_v43 = vand.u32 65535, %v108_v40 }
 0x33e   :  { %v112_v42 = vcvt.s32.f32 %v110_v41  ;;  %v111_v45 = vcvt.s32.f32 %v109_v43 }
 0x340   :  { %113 = vmin.xlane.f32.xlu0 %v112_v42 }
 0x3cd   :  { %v114_v44 = vpop.xlane.xlu0 %113 }
 0x3ce   :  { %vm115_vm7 = vcmp.eq.f32.partialorder %v112_v42, %v114_v44  ;;  %v120_v47 = vcvt.f32.s32 %v114_v44 }
 0x3cf   :  { %v116_v46 = vsel %vm115_vm7, %v111_v45, inf }
 0x3d0   :  { %117 = vmin.xlane.f32.xlu1 %v116_v46  ;;  %v121_v49 = vshll.u32 %v120_v47, 16 }
 0x45d   :  { %v118_v48 = vpop.xlane.xlu1 %117 }
 0x45e   :  { %v119_v50 = vcvt.f32.s32 %v118_v48 }
 0x460   :  { %v122_v51 = vadd.s32 %v121_v49, %v119_v50 }
 0x462   :  { %vm123_vm8 = vcmp.eq.s32.totalorder %v614_v5, %v122_v51 }
 0x463   :  { %v127_v53 = vsel %vm123_vm8, 1e+30, %v102_v36  ;;  %v433_v54 = vsel %vm123_vm8, 1.0, %v570_v1 }
 0x464   :  { %v128_v55 = vsel %vm67_vm2, %v127_v53, inf  ;;  %v126_v56 = vadd.f32 %v433_v54, %v432_v52 }
 0x465   :  { %129 = vmin.xlane.f32.xlu0 %v128_v55 }
 0x4f2   :  { %v130_v57 = vpop.xlane.xlu0 %129 }
 0x4f3   :  { %vm131_vm9 = vcmp.eq.f32.partialorder %v127_v53, %v130_v57 }
 0x4f4   :  { %v132_v58 = vsel %vm131_vm9, %v614_v5, 8 }
 0x4f5   :  { %v133_v59 = vsel %vm67_vm2, %v132_v58, 2147483647 }
 0x4f6   :  { %v135_v60 = vshra.s32 %v133_v59, 16  ;;  %v134_v62 = vand.u32 65535, %v133_v59 }
 0x4f8   :  { %v137_v61 = vcvt.s32.f32 %v135_v60  ;;  %v136_v0 = vcvt.s32.f32 %v134_v62 }
 0x4fa   :  { %138 = vmin.xlane.f32.xlu1 %v137_v61 }
 0x587   :  { %v139_v63 = vpop.xlane.xlu1 %138 }
 0x588   :  { %vm140_vm10 = vcmp.eq.f32.partialorder %v137_v61, %v139_v63  ;;  %v145_v14 = vcvt.f32.s32 %v139_v63 }
 0x589   :  { %v141_v3 = vsel %vm140_vm10, %v136_v0, inf }
 0x58a   :  { %142 = vmin.xlane.f32.xlu0 %v141_v3  ;;  %v146_v16 = vshll.u32 %v145_v14, 16 }
 0x617   :  { %v143_v15 = vpop.xlane.xlu0 %142 }
 0x618   :  { %v144_v17 = vcvt.f32.s32 %v143_v15 }
 0x61a   :  { %v147_v18 = vadd.s32 %v146_v16, %v144_v17 }
 0x61c   :  { %vm148_vm12 = vcmp.eq.s32.totalorder %v614_v5, %v147_v18  ;;  %v535_v5 = vld [vmem:[%s726_s2 + $0x10] sm:$0xff]   ;;  %s546_s2 = scalar_lea.vmem %s425_s23, 128 }
 0x61d   :  { %v434_v19 = vsel %vm148_vm12, 1.0, %v570_v1  ;;  %p547_p0 = scmp.ne.s32.totalorder %s425_s23, %s546_s2  ;;  %p552_p2 = scmp.lt.s32.totalorder %s546_s2, %s546_s2 }
 0x61e   :  { %v151_v20 = vadd.f32 %v434_v19, %v126_v56 }
 0x61f   :  { %p553_p3 = por %p552_p2, %p551_p1 }
 0x620   :  { %v152_v22 = vpack.c.bf16 %v151_v20, %v151_v20 }
 0x621   :  { %p554_p4 = pnand %p553_p3, %p547_p0 }
 0x622   :  { %484 = vmatmul.mubr.msk.bf16.vlgmr.msra.gmra.mrb[0].mxu1 %vm67_vm2, %v152_v22 }
 0x623   :  { %488 = vmatpush3.bf16.msra.mxu1 %v531_v21  ;;  %503 = vmatprep.mubr.msk.bf16.mxu1 %vm571_vm0, %v570_v1 }
 0x624   :  { %489 = vmatprep.subr.bf16.mxu1 %v570_v1 }
 0x627   :  { %490 = vmatpush3.bf16.msra.mxu1 %v533_v2 }
 0x628   :  { %491 = vmatprep.subr.bf16.mxu1 %v570_v1 }
 0x62b   :  { %492 = vmatpush3.bf16.msra.mxu1 %v535_v5 }
 0x62c   :  { %493 = vmatprep.subr.bf16.mxu1 %v570_v1 }
 0x62f   :  { %494 = vmatpush3.bf16.msra.mxu1 %v537_v23 }
 0x630   :  { %495 = vmatprep.subr.bf16.mxu1 %v570_v1 }
 0x633   :  { %496 = vmatpush3.bf16.msra.mxu1 %v539_v24 }
 0x634   :  { %497 = vmatprep.subr.bf16.mxu1 %v570_v1 }
 0x637   :  { %498 = vmatpush3.bf16.msra.mxu1 %v541_v25 }
 0x638   :  { %499 = vmatprep.subr.bf16.mxu1 %v570_v1 }
 0x63b   :  { %500 = vmatpush3.bf16.msra.mxu1 %v543_v26 }
 0x63c   :  { %501 = vmatprep.subr.bf16.mxu1 %v570_v1  ;;  %v452_v1 = vld [vmem:[%s727_s3] ss:$0 sm:$0xff] }
 0x63f   :  { %502 = vmatpush3.bf16.msra.mxu1 %v545_v27 }
 0x6f5   :  { %v227_v32 = vpop.f32.mrb[0].mxu1 }
 0x6f6   :  { %v233_v33 = vpack.c.bf16 %v227_v32, %v227_v32  ;;  %v485_v34 = vpop.f32.mrb[1].mxu1 }
 0x6f7   :  { %v230_v35 = vpop.f32.mrb[2].mxu1 }
 0x6f8   :  { %v486_v36 = vpop.f32.mrb[3].mxu1  ;;  %504 = vmatmul.mubr.bf16.vlgmr.msra.gmra.mrb[4].mxu1 %v233_v33 }
 0x7cb   :  { %v316_v37 = vpop.f32.mrb[4].mxu1 }
 0x7cc   :  { %v405_v38 = vadd.f32 %v404_v28, %v316_v37  ;;  %v505_v39 = vpop.f32.mrb[5].mxu1 }
 0x7cd   :  { %v319_v40 = vpop.f32.mrb[6].mxu1 }
 0x7ce   :  { %v506_v41 = vpop.f32.mrb[7].mxu1  ;;  %v416_v42 = vadd.f32 %v452_v1, %v405_v38 }
 0x7d0   :  { %417 = vst [vmem:[#allocation2] sm:$0xff] %v416_v42 }
 0x7d1   :  { %557 = shalt.err (!%p554_p4)
}
 0x7d2   :  { %s558_s3 = scalar_lea.hbm %s728_s4, 128 }
 0x7d3   :  { %p559_p5 = scmp.ne.s32.totalorder %s728_s4, %s558_s3  ;;  %p562_p6 = scmp.lt.u32.totalorder %s558_s3, %s728_s4 }
 0x7d5   :  { %p564_p7 = pnand %p562_p6, %p559_p5 }
 0x7d7   :  { %567 = shalt.err (!%p564_p7)
}
 0x7d8   :  { %427 = dma.vmem_to_hbm [thread:$0]  %s425_s23, 128, %s728_s4, [#allocation3]  }
 0x7d9   :  { %568 = dma.done.wait [#allocation3], 128  }
 0x7da   :  { %569 = vsyncadd [#allocation3], 4294967168 }
 0x7db   :  { %431 = vsyncpa [#allocation3], 1 }

</bundles_post_ra>
